<compile_context>
chip_gen: v6e
topology: v6e:2x2x1
jax: 0.10.0
libtpu: 0.0.40
codegen_flags: <defaults>
</compile_context>

<pallas_src>
import functools

import jax
import jax.numpy as jnp
from jax.experimental import pallas as pl
from jax.experimental.pallas import tpu as pltpu


def _attention_kernel(x_ref, wq_ref, wk_ref, wv_ref, wo_ref, bo_ref,
                      out_ref, attn_ref, k_scr, v_scr,
                      *, num_heads, block_q, mxu_dtype, approx_recip):
    """Grid = (batch, query_tile).

    x_ref    : (1, N, C)        full sequence of one batch element (mxu_dtype)
    wq_ref   : (H, C, Dh)       head-split Q weight, softmax scale pre-folded
    wk_ref   : (H, C, Dh)       head-split K weight
    wv_ref   : (H, C, Dh)       head-split V weight
    wo_ref   : (C, C)           Wproj^T (rows head-major (h, d))
    bo_ref   : (1, C)           proj bias (f32)
    out_ref  : (1, Nq, C)       projected output tile
    attn_ref : (1, H, Nq, N)    softmax attention probabilities tile
    k_scr    : (H, N, Dh)       VMEM scratch, persists across query tiles
    v_scr    : (H, N, Dh)       VMEM scratch, persists across query tiles
    """
    H = num_heads
    N = x_ref.shape[1]
    C = x_ref.shape[2]
    qi = pl.program_id(1)

    # K / V projections for the full sequence are computed once per batch
    # element (first query tile) and kept in VMEM scratch for the remaining
    # query tiles.  The query-tile grid axis is "arbitrary" (sequential), so
    # this carried dependency is legal; the batch axis stays "parallel".
    @pl.when(qi == 0)
    def _():
        x_all = jnp.broadcast_to(x_ref[0], (H, N, C))            # (H, N, C)
        k_scr[...] = jnp.einsum('hnc,hcd->hnd', x_all, wk_ref[...],
                                preferred_element_type=jnp.float32
                                ).astype(k_scr.dtype)
        v_scr[...] = jnp.einsum('hnc,hcd->hnd', x_all, wv_ref[...],
                                preferred_element_type=jnp.float32
                                ).astype(v_scr.dtype)

    # Current query tile (slice of the batch-resident x block).
    q_start = pl.multiple_of(qi * block_q, block_q)
    x_q = x_ref[0, pl.ds(q_start, block_q), :]                   # (Nq, C)
    x_qh = jnp.broadcast_to(x_q, (H, block_q, C))                # (H, Nq, C)

    # Q projection as a head-batched matmul against head-split weight slabs
    # (K = C full systolic depth per head, no lane-slice/stack head split;
    # the softmax scale is already folded into wq).
    q_h = jnp.einsum('hnc,hcd->hnd', x_qh, wq_ref[...],
                     preferred_element_type=jnp.float32)         # (H, Nq, Dh)

    # Scaled scores + numerically stable softmax (softmax math stays f32).
    s = jnp.einsum('hnd,hmd->hnm', q_h.astype(mxu_dtype), k_scr[...],
                   preferred_element_type=jnp.float32)           # (H, Nq, N)
    s = s - jnp.max(s, axis=-1, keepdims=True)
    p = jnp.exp(s)
    p = p * pl.reciprocal(jnp.sum(p, axis=-1, keepdims=True),
                          approx=approx_recip)

    attn_ref[0] = p.astype(attn_ref.dtype)

    # Per-head context, then heads merged along lanes and projected with a
    # single (Nq, C) @ (C, C) matmul: fused head reduction, no (H, Nq, C)
    # intermediate, full K = C contraction depth on the MXU.
    ctx = jnp.einsum('hnm,hmd->hnd', p.astype(mxu_dtype), v_scr[...],
                     preferred_element_type=jnp.float32)         # (H, Nq, Dh)
    ctx_merged = jnp.concatenate([ctx[h] for h in range(H)], axis=-1)
    y = jnp.dot(ctx_merged.astype(mxu_dtype), wo_ref[...],
                preferred_element_type=jnp.float32)              # (Nq, C)
    out_ref[0] = (y + bo_ref[...]).astype(out_ref.dtype)


def attention_forward(x, w_qkv, w_proj, b_proj, *, num_heads, block_q=128,
                      mxu_dtype=jnp.bfloat16, attn_dtype=jnp.bfloat16,
                      approx_softmax_recip=True):
    """x: (B, N, C).  w_qkv: (3C, C), w_proj: (C, C), b_proj: (1, C) in
    nn.Linear layout (y = x @ W.T + b).  Returns (out (B,N,C), attn (B,H,N,N)).

    Defaults are the throughput configuration (bf16 MXU operands with f32
    accumulation, f32 softmax, bf16 attn writeback, EUP approximate
    reciprocal); pass float32 / approx_softmax_recip=False for a
    reference-precision run.
    """
    B, N, C = x.shape
    assert C % num_heads == 0
    H = num_heads
    Dh = C // H
    scale = Dh ** (-0.5)

    block_q = min(block_q, N)
    # TODO(synk): ragged last query tile (N % block_q != 0) needs pad masking.
    assert N % block_q == 0, "N must be divisible by block_q"
    assert block_q == N or block_q % 8 == 0, "block_q must be 8-aligned"
    num_q = N // block_q

    # --- trace-time weight plumbing (free): head-split slabs, pre-transposed
    # proj weight, softmax scale folded into the Q slab. ---
    w_q, w_k, w_v = w_qkv[:C], w_qkv[C:2 * C], w_qkv[2 * C:]

    def head_slab(w):                       # (C, C) torch layout -> (H, C, Dh)
        return jnp.transpose(w.reshape(H, Dh, C), (0, 2, 1))

    wq_h = (head_slab(w_q) * scale).astype(mxu_dtype)
    wk_h = head_slab(w_k).astype(mxu_dtype)
    wv_h = head_slab(w_v).astype(mxu_dtype)
    wproj_t = w_proj.T.astype(mxu_dtype)    # (C, C), rows already (h, d)-major
    b_in = b_proj.astype(jnp.float32)
    x_in = x.astype(mxu_dtype)

    kernel = functools.partial(
        _attention_kernel, num_heads=H, block_q=block_q,
        mxu_dtype=mxu_dtype, approx_recip=approx_softmax_recip)

    # Grid-invariant weights/bias: whole-array VMEM residency (single copy,
    # no per-step double buffering).  x is pipelined per batch element.
    weight_spec = pl.BlockSpec(memory_space=pltpu.MemorySpace.VMEM)

    grid_spec = pltpu.PrefetchScalarGridSpec(
        num_scalar_prefetch=0,
        grid=(B, num_q),
        in_specs=[
            pl.BlockSpec((1, N, C), lambda b, q: (b, 0, 0)),     # x (full seq)
            weight_spec,                                          # wq_h
            weight_spec,                                          # wk_h
            weight_spec,                                          # wv_h
            weight_spec,                                          # wproj_t
            weight_spec,                                          # b_proj
        ],
        out_specs=(
            pl.BlockSpec((1, block_q, C), lambda b, q: (b, q, 0)),        # out
            pl.BlockSpec((1, H, block_q, N), lambda b, q: (b, 0, q, 0)),  # attn
        ),
        scratch_shapes=[
            pltpu.VMEM((H, N, Dh), mxu_dtype),    # K (per-batch, reused)
            pltpu.VMEM((H, N, Dh), mxu_dtype),    # V (per-batch, reused)
        ],
    )

    out, attn = pl.pallas_call(
        kernel,
        grid_spec=grid_spec,
        out_shape=(
            jax.ShapeDtypeStruct((B, N, C), x.dtype),
            jax.ShapeDtypeStruct((B, H, N, N), attn_dtype),
        ),
        compiler_params=pltpu.CompilerParams(
            dimension_semantics=("parallel", "arbitrary"),
            vmem_limit_bytes=32 * 1024 * 1024),
    )(x_in, wq_h, wk_h, wv_h, wproj_t, b_in)
    return out, attn


def attention_reference(x, w_qkv, w_proj, b_proj, *, num_heads):
    """Pure-JAX reference mirroring the PyTorch forward (f32 matmuls)."""
    B, N, C = x.shape
    head_dim = C // num_heads
    scale = head_dim ** (-0.5)
    hi = jax.lax.Precision.HIGHEST
    qkv = jnp.einsum('bnc,dc->bnd', x, w_qkv, precision=hi)       # (B, N, 3C)
    qkv = qkv.reshape(B, N, 3, num_heads, head_dim)
    qkv = jnp.transpose(qkv, (2, 0, 3, 1, 4))                     # (3,B,H,N,Dh)
    q, k, v = qkv[0], qkv[1], qkv[2]
    attn = jnp.einsum('bhnd,bhmd->bhnm', q, k, precision=hi) * scale
    attn = jax.nn.softmax(attn, axis=-1)
    ctx = jnp.einsum('bhnm,bhmd->bhnd', attn, v, precision=hi)    # (B,H,N,Dh)
    ctx = jnp.transpose(ctx, (0, 2, 1, 3)).reshape(B, N, C)
    out = jnp.einsum('bnc,dc->bnd', ctx, w_proj, precision=hi) + b_proj[0]
    return out, attn


if __name__ == "__main__":
    # Small shapes consistent with the module: dim=32, num_heads=8 -> head_dim=4
    B, N, C = 2, 16, 32
    num_heads = 8

    key = jax.random.PRNGKey(0)
    kx, kqkv, kproj, kb = jax.random.split(key, 4)

    # Deterministic synthetic parameters (nn.Linear layout: [out, in]).
    x = jax.random.normal(kx, (B, N, C), dtype=jnp.float32)
    w_qkv = jax.random.normal(kqkv, (3 * C, C), dtype=jnp.float32) * 0.05
    w_proj = jax.random.normal(kproj, (C, C), dtype=jnp.float32) * 0.05
    b_proj = jax.random.normal(kb, (1, C), dtype=jnp.float32) * 0.05

    ref_out, ref_attn = attention_reference(x, w_qkv, w_proj, b_proj,
                                            num_heads=num_heads)

    # Reference-precision configuration: f32 MXU operands, exact reciprocal,
    # two query tiles per batch element (exercises the K/V scratch reuse and
    # the multi-step pipeline path).
    out, attn = attention_forward(
        x, w_qkv, w_proj, b_proj, num_heads=num_heads, block_q=8,
        mxu_dtype=jnp.float32, attn_dtype=jnp.float32,
        approx_softmax_recip=False)
    jax.block_until_ready((out, attn))
    assert jnp.allclose(out, ref_out, atol=2e-3, rtol=2e-3)
    assert jnp.allclose(attn, ref_attn, atol=1e-3, rtol=1e-3)

    # Default throughput configuration: bf16 MXU operands (f32 accumulation),
    # bf16 attn writeback, EUP approximate reciprocal (looser tolerance).
    out16, attn16 = attention_forward(x, w_qkv, w_proj, b_proj,
                                      num_heads=num_heads)
    jax.block_until_ready((out16, attn16))
    assert jnp.allclose(out16, ref_out, atol=5e-2, rtol=5e-2)
    assert jnp.allclose(attn16.astype(jnp.float32), ref_attn,
                        atol=5e-2, rtol=5e-2)

    print("KERNEL_OK")
</pallas_src>

<mosaic_0001>
module attributes {stable_mosaic.version = 11 : i64} {
  func.func @_attention_kernel(%arg0: i32, %arg1: i32, %arg2: memref<1x16x32xf32, #tpu.memory_space<vmem>>, %arg3: memref<8x32x4xf32, #tpu.memory_space<vmem>>, %arg4: memref<8x32x4xf32, #tpu.memory_space<vmem>>, %arg5: memref<8x32x4xf32, #tpu.memory_space<vmem>>, %arg6: memref<32x32xf32, #tpu.memory_space<vmem>>, %arg7: memref<1x32xf32, #tpu.memory_space<vmem>>, %arg8: memref<1x8x32xf32, #tpu.memory_space<vmem>>, %arg9: memref<1x8x8x16xf32, #tpu.memory_space<vmem>>, %arg10: memref<8x16x4xf32, #tpu.memory_space<vmem>>, %arg11: memref<8x16x4xf32, #tpu.memory_space<vmem>>) attributes {dimension_semantics = [#tpu.dimension_semantics<parallel>, #tpu.dimension_semantics<arbitrary>], iteration_bounds = array<i64: 2, 2>, scalar_prefetch = 0 : i64, scratch_operands = 2 : i64, tpu.core_type = #tpu.core_type<tc>, window_params = [{transform_indices = @transform_0, window_bounds = array<i64: 1, 16, 32>}, {pipeline_mode = #tpu.pipeline_mode<synchronous>, transform_indices = @transform_1, window_bounds = array<i64: 8, 32, 4>}, {pipeline_mode = #tpu.pipeline_mode<synchronous>, transform_indices = @transform_2, window_bounds = array<i64: 8, 32, 4>}, {pipeline_mode = #tpu.pipeline_mode<synchronous>, transform_indices = @transform_3, window_bounds = array<i64: 8, 32, 4>}, {pipeline_mode = #tpu.pipeline_mode<synchronous>, transform_indices = @transform_4, window_bounds = array<i64: 32, 32>}, {pipeline_mode = #tpu.pipeline_mode<synchronous>, transform_indices = @transform_5, window_bounds = array<i64: 1, 32>}, {transform_indices = @transform_6, window_bounds = array<i64: 1, 8, 32>}, {transform_indices = @transform_7, window_bounds = array<i64: 1, 8, 8, 16>}]} {
    %c0_i32 = arith.constant 0 : i32
    %0 = arith.cmpi eq, %arg1, %c0_i32 : i32
    %1 = arith.extui %0 : i1 to i32
    %c0_i32_0 = arith.constant 0 : i32
    %2 = arith.cmpi ne, %1, %c0_i32_0 : i32
    scf.if %2 {
      %c0_27 = arith.constant 0 : index
      %c0_28 = arith.constant 0 : index
      %c0_29 = arith.constant 0 : index
      %54 = vector.load %arg2[%c0_27, %c0_28, %c0_29] : memref<1x16x32xf32, #tpu.memory_space<vmem>>, vector<1x16x32xf32>
      %55 = vector.shape_cast %54 : vector<1x16x32xf32> to vector<16x32xf32>
      %56 = vector.shape_cast %55 : vector<16x32xf32> to vector<1x16x32xf32>
      %57 = vector.broadcast %56 : vector<1x16x32xf32> to vector<8x16x32xf32>
      %c0_30 = arith.constant 0 : index
      %c0_31 = arith.constant 0 : index
      %c0_32 = arith.constant 0 : index
      %58 = vector.load %arg4[%c0_30, %c0_31, %c0_32] : memref<8x32x4xf32, #tpu.memory_space<vmem>>, vector<8x32x4xf32>
      "tpu.trace_start"() <{level = 10 : i32, message = "hnc,hcd->hnd"}> : () -> ()
      %cst_33 = arith.constant dense<0.000000e+00> : vector<8x16x4xf32>
      %59 = tpu.matmul %57, %58, %cst_33 {dimension_numbers = #tpu.dot_dimension_numbers<[2], [1], [1], [2], [0, 0, 0, 1, 1, 2], [0], [0]>} : vector<8x16x32xf32>, vector<8x32x4xf32>, vector<8x16x4xf32> -> vector<8x16x4xf32>
      "tpu.trace_stop"() : () -> ()
      %c0_34 = arith.constant 0 : index
      %c0_35 = arith.constant 0 : index
      %c0_36 = arith.constant 0 : index
      %60 = vector.load %arg10[%c0_34, %c0_35, %c0_36] : memref<8x16x4xf32, #tpu.memory_space<vmem>>, vector<8x16x4xf32>
      tpu.vector_store %arg10[%c0_34, %c0_35, %c0_36], %59 {strides = array<i32>} : memref<8x16x4xf32, #tpu.memory_space<vmem>>, vector<8x16x4xf32>,
      %c0_37 = arith.constant 0 : index
      %c0_38 = arith.constant 0 : index
      %c0_39 = arith.constant 0 : index
      %61 = vector.load %arg5[%c0_37, %c0_38, %c0_39] : memref<8x32x4xf32, #tpu.memory_space<vmem>>, vector<8x32x4xf32>
      "tpu.trace_start"() <{level = 10 : i32, message = "hnc,hcd->hnd"}> : () -> ()
      %cst_40 = arith.constant dense<0.000000e+00> : vector<8x16x4xf32>
      %62 = tpu.matmul %57, %61, %cst_40 {dimension_numbers = #tpu.dot_dimension_numbers<[2], [1], [1], [2], [0, 0, 0, 1, 1, 2], [0], [0]>} : vector<8x16x32xf32>, vector<8x32x4xf32>, vector<8x16x4xf32> -> vector<8x16x4xf32>
      "tpu.trace_stop"() : () -> ()
      %c0_41 = arith.constant 0 : index
      %c0_42 = arith.constant 0 : index
      %c0_43 = arith.constant 0 : index
      %63 = vector.load %arg11[%c0_41, %c0_42, %c0_43] : memref<8x16x4xf32, #tpu.memory_space<vmem>>, vector<8x16x4xf32>
      tpu.vector_store %arg11[%c0_41, %c0_42, %c0_43], %62 {strides = array<i32>} : memref<8x16x4xf32, #tpu.memory_space<vmem>>, vector<8x16x4xf32>,
    } else {
    }
    %c8_i32 = arith.constant 8 : i32
    %3 = arith.muli %arg1, %c8_i32 : i32
    %4 = tpu.assume_multiple %3, 8 : i32
    %c0 = arith.constant 0 : index
    %5 = arith.index_cast %4 : i32 to index
    %c0_1 = arith.constant 0 : index
    %6 = vector.load %arg2[%c0, %5, %c0_1] : memref<1x16x32xf32, #tpu.memory_space<vmem>>, vector<1x8x32xf32>
    %7 = vector.shape_cast %6 : vector<1x8x32xf32> to vector<8x32xf32>
    %8 = vector.shape_cast %7 : vector<8x32xf32> to vector<1x8x32xf32>
    %9 = vector.broadcast %8 : vector<1x8x32xf32> to vector<8x8x32xf32>
    %c0_2 = arith.constant 0 : index
    %c0_3 = arith.constant 0 : index
    %c0_4 = arith.constant 0 : index
    %10 = vector.load %arg3[%c0_2, %c0_3, %c0_4] : memref<8x32x4xf32, #tpu.memory_space<vmem>>, vector<8x32x4xf32>
    "tpu.trace_start"() <{level = 10 : i32, message = "hnc,hcd->hnd"}> : () -> ()
    %cst = arith.constant dense<0.000000e+00> : vector<8x8x4xf32>
    %11 = tpu.matmul %9, %10, %cst {dimension_numbers = #tpu.dot_dimension_numbers<[2], [1], [1], [2], [0, 0, 0, 1, 1, 2], [0], [0]>} : vector<8x8x32xf32>, vector<8x32x4xf32>, vector<8x8x4xf32> -> vector<8x8x4xf32>
    "tpu.trace_stop"() : () -> ()
    %c0_5 = arith.constant 0 : index
    %c0_6 = arith.constant 0 : index
    %c0_7 = arith.constant 0 : index
    %12 = vector.load %arg10[%c0_5, %c0_6, %c0_7] : memref<8x16x4xf32, #tpu.memory_space<vmem>>, vector<8x16x4xf32>
    "tpu.trace_start"() <{level = 10 : i32, message = "hnd,hmd->hnm"}> : () -> ()
    %cst_8 = arith.constant dense<0.000000e+00> : vector<8x8x16xf32>
    %13 = tpu.matmul %11, %12, %cst_8 {dimension_numbers = #tpu.dot_dimension_numbers<[2], [2], [1], [1], [0, 0, 0, 1, 1, 1], [0], [0]>} : vector<8x8x4xf32>, vector<8x16x4xf32>, vector<8x8x16xf32> -> vector<8x8x16xf32>
    "tpu.trace_stop"() : () -> ()
    %cst_9 = arith.constant dense<0xFF800000> : vector<8x8xf32>
    %14 = vector.multi_reduction <maximumf>, %13, %cst_9 [2] : vector<8x8x16xf32> to vector<8x8xf32>
    %15 = vector.shape_cast %14 : vector<8x8xf32> to vector<8x8x1xf32>
    %16 = vector.broadcast %15 : vector<8x8x1xf32> to vector<8x8x16xf32>
    %17 = arith.subf %13, %16 : vector<8x8x16xf32>
    %18 = math.exp %17 : vector<8x8x16xf32>
    %cst_10 = arith.constant dense<0.000000e+00> : vector<8x8xf32>
    %19 = vector.multi_reduction <add>, %18, %cst_10 [2] : vector<8x8x16xf32> to vector<8x8xf32>
    %20 = vector.shape_cast %19 : vector<8x8xf32> to vector<8x8x1xf32>
    %21 = tpu.reciprocal %20 : vector<8x8x1xf32> -> vector<8x8x1xf32>
    %22 = vector.broadcast %21 : vector<8x8x1xf32> to vector<8x8x16xf32>
    %23 = arith.mulf %18, %22 : vector<8x8x16xf32>
    %c0_11 = arith.constant 0 : index
    %c0_12 = arith.constant 0 : index
    %c0_13 = arith.constant 0 : index
    %c0_14 = arith.constant 0 : index
    %24 = vector.load %arg9[%c0_11, %c0_12, %c0_13, %c0_14] : memref<1x8x8x16xf32, #tpu.memory_space<vmem>>, vector<1x8x8x16xf32>
    %25 = vector.shape_cast %24 : vector<1x8x8x16xf32> to vector<8x8x16xf32>
    %26 = vector.shape_cast %23 : vector<8x8x16xf32> to vector<1x8x8x16xf32>
    tpu.vector_store %arg9[%c0_11, %c0_12, %c0_13, %c0_14], %26 {strides = array<i32>} : memref<1x8x8x16xf32, #tpu.memory_space<vmem>>, vector<1x8x8x16xf32>,
    %c0_15 = arith.constant 0 : index
    %c0_16 = arith.constant 0 : index
    %c0_17 = arith.constant 0 : index
    %27 = vector.load %arg11[%c0_15, %c0_16, %c0_17] : memref<8x16x4xf32, #tpu.memory_space<vmem>>, vector<8x16x4xf32>
    "tpu.trace_start"() <{level = 10 : i32, message = "hnm,hmd->hnd"}> : () -> ()
    %cst_18 = arith.constant dense<0.000000e+00> : vector<8x8x4xf32>
    %28 = tpu.matmul %23, %27, %cst_18 {dimension_numbers = #tpu.dot_dimension_numbers<[2], [1], [1], [2], [0, 0, 0, 1, 1, 2], [0], [0]>} : vector<8x8x16xf32>, vector<8x16x4xf32>, vector<8x8x4xf32> -> vector<8x8x4xf32>
    "tpu.trace_stop"() : () -> ()
    %29 = vector.extract_strided_slice %28 {offsets = [0, 0, 0], sizes = [1, 8, 4], strides = [1, 1, 1]} : vector<8x8x4xf32> to vector<1x8x4xf32>
    %30 = vector.shape_cast %29 : vector<1x8x4xf32> to vector<8x4xf32>
    %31 = vector.extract_strided_slice %28 {offsets = [1, 0, 0], sizes = [1, 8, 4], strides = [1, 1, 1]} : vector<8x8x4xf32> to vector<1x8x4xf32>
    %32 = vector.shape_cast %31 : vector<1x8x4xf32> to vector<8x4xf32>
    %33 = vector.extract_strided_slice %28 {offsets = [2, 0, 0], sizes = [1, 8, 4], strides = [1, 1, 1]} : vector<8x8x4xf32> to vector<1x8x4xf32>
    %34 = vector.shape_cast %33 : vector<1x8x4xf32> to vector<8x4xf32>
    %35 = vector.extract_strided_slice %28 {offsets = [3, 0, 0], sizes = [1, 8, 4], strides = [1, 1, 1]} : vector<8x8x4xf32> to vector<1x8x4xf32>
    %36 = vector.shape_cast %35 : vector<1x8x4xf32> to vector<8x4xf32>
    %37 = vector.extract_strided_slice %28 {offsets = [4, 0, 0], sizes = [1, 8, 4], strides = [1, 1, 1]} : vector<8x8x4xf32> to vector<1x8x4xf32>
    %38 = vector.shape_cast %37 : vector<1x8x4xf32> to vector<8x4xf32>
    %39 = vector.extract_strided_slice %28 {offsets = [5, 0, 0], sizes = [1, 8, 4], strides = [1, 1, 1]} : vector<8x8x4xf32> to vector<1x8x4xf32>
    %40 = vector.shape_cast %39 : vector<1x8x4xf32> to vector<8x4xf32>
    %41 = vector.extract_strided_slice %28 {offsets = [6, 0, 0], sizes = [1, 8, 4], strides = [1, 1, 1]} : vector<8x8x4xf32> to vector<1x8x4xf32>
    %42 = vector.shape_cast %41 : vector<1x8x4xf32> to vector<8x4xf32>
    %43 = vector.extract_strided_slice %28 {offsets = [7, 0, 0], sizes = [1, 8, 4], strides = [1, 1, 1]} : vector<8x8x4xf32> to vector<1x8x4xf32>
    %44 = vector.shape_cast %43 : vector<1x8x4xf32> to vector<8x4xf32>
    %45 = tpu.concatenate %30, %32, %34, %36, %38, %40, %42, %44 in 1 : vector<8x4xf32>, vector<8x4xf32>, vector<8x4xf32>, vector<8x4xf32>, vector<8x4xf32>, vector<8x4xf32>, vector<8x4xf32>, vector<8x4xf32> -> vector<8x32xf32>
    %c0_19 = arith.constant 0 : index
    %c0_20 = arith.constant 0 : index
    %46 = vector.load %arg6[%c0_19, %c0_20] : memref<32x32xf32, #tpu.memory_space<vmem>>, vector<32x32xf32>
    %cst_21 = arith.constant dense<0.000000e+00> : vector<8x32xf32>
    %47 = tpu.matmul %45, %46, %cst_21 {dimension_numbers = #tpu.dot_dimension_numbers<[1], [0], [0], [1], [0, 0, 1, 1], [], []>} : vector<8x32xf32>, vector<32x32xf32>, vector<8x32xf32> -> vector<8x32xf32>
    %c0_22 = arith.constant 0 : index
    %c0_23 = arith.constant 0 : index
    %48 = vector.load %arg7[%c0_22, %c0_23] : memref<1x32xf32, #tpu.memory_space<vmem>>, vector<1x32xf32>
    %49 = vector.broadcast %48 : vector<1x32xf32> to vector<8x32xf32>
    %50 = arith.addf %47, %49 : vector<8x32xf32>
    %c0_24 = arith.constant 0 : index
    %c0_25 = arith.constant 0 : index
    %c0_26 = arith.constant 0 : index
    %51 = vector.load %arg8[%c0_24, %c0_25, %c0_26] : memref<1x8x32xf32, #tpu.memory_space<vmem>>, vector<1x8x32xf32>
    %52 = vector.shape_cast %51 : vector<1x8x32xf32> to vector<8x32xf32>
    %53 = vector.shape_cast %50 : vector<8x32xf32> to vector<1x8x32xf32>
    tpu.vector_store %arg8[%c0_24, %c0_25, %c0_26], %53 {strides = array<i32>} : memref<1x8x32xf32, #tpu.memory_space<vmem>>, vector<1x8x32xf32>,
    return
  }
  func.func @transform_0(%arg0: i32, %arg1: i32) -> (i32, i32, i32) {
    %c0_i32 = arith.constant 0 : i32
    %c0_i32_0 = arith.constant 0 : i32
    %c0_i32_1 = arith.constant 0 : i32
    return %arg0, %c0_i32, %c0_i32_0 : i32, i32, i32
  }
  func.func @transform_1(%arg0: i32, %arg1: i32) -> (i32, i32, i32) {
    %c0_i32 = arith.constant 0 : i32
    %c0_i32_0 = arith.constant 0 : i32
    %c0_i32_1 = arith.constant 0 : i32
    %c0_i32_2 = arith.constant 0 : i32
    return %c0_i32, %c0_i32_0, %c0_i32_1 : i32, i32, i32
  }
  func.func @transform_2(%arg0: i32, %arg1: i32) -> (i32, i32, i32) {
    %c0_i32 = arith.constant 0 : i32
    %c0_i32_0 = arith.constant 0 : i32
    %c0_i32_1 = arith.constant 0 : i32
    %c0_i32_2 = arith.constant 0 : i32
    return %c0_i32, %c0_i32_0, %c0_i32_1 : i32, i32, i32
  }
  func.func @transform_3(%arg0: i32, %arg1: i32) -> (i32, i32, i32) {
    %c0_i32 = arith.constant 0 : i32
    %c0_i32_0 = arith.constant 0 : i32
    %c0_i32_1 = arith.constant 0 : i32
    %c0_i32_2 = arith.constant 0 : i32
    return %c0_i32, %c0_i32_0, %c0_i32_1 : i32, i32, i32
  }
  func.func @transform_4(%arg0: i32, %arg1: i32) -> (i32, i32) {
    %c0_i32 = arith.constant 0 : i32
    %c0_i32_0 = arith.constant 0 : i32
    %c0_i32_1 = arith.constant 0 : i32
    return %c0_i32, %c0_i32_0 : i32, i32
  }
  func.func @transform_5(%arg0: i32, %arg1: i32) -> (i32, i32) {
    %c0_i32 = arith.constant 0 : i32
    %c0_i32_0 = arith.constant 0 : i32
    %c0_i32_1 = arith.constant 0 : i32
    return %c0_i32, %c0_i32_0 : i32, i32
  }
  func.func @transform_6(%arg0: i32, %arg1: i32) -> (i32, i32, i32) {
    %c0_i32 = arith.constant 0 : i32
    %c0_i32_0 = arith.constant 0 : i32
    return %arg0, %arg1, %c0_i32 : i32, i32, i32
  }
  func.func @transform_7(%arg0: i32, %arg1: i32) -> (i32, i32, i32, i32) {
    %c0_i32 = arith.constant 0 : i32
    %c0_i32_0 = arith.constant 0 : i32
    %c0_i32_1 = arith.constant 0 : i32
    return %arg0, %c0_i32, %arg1, %c0_i32_0 : i32, i32, i32, i32
  }
}

</mosaic_0001>

<bundles_post_ra>
// kernel: tpu_custom_call.1
= control target key start
LH: loop header
LB: loop body
LE: loop exit
PB: predicated region body
PF: predicated region fallthrough
CT: control target
= control target key end

     0   :  { %s5612_s0 = inlined_call_operand.vmem [shape: f32[2,16,32], index: 0, kind: input, shape index: {}]   ;;  %s5613_s1 = inlined_call_operand.vmem [shape: f32[8,32,4], index: 1, kind: input, shape index: {}]   ;;  %s5614_s2 = inlined_call_operand.vmem [shape: f32[8,32,4], index: 2, kind: input, shape index: {}]   ;;  %s5615_s3 = inlined_call_operand.vmem [shape: f32[8,32,4], index: 3, kind: input, shape index: {}]   ;;  %s5616_s4 = inlined_call_operand.vmem [shape: f32[32,32], index: 4, kind: input, shape index: {}]   ;;  %s5617_s5 = inlined_call_operand.vmem [shape: f32[1,32], index: 5, kind: input, shape index: {}]   ;;  %s5618_s6 = inlined_call_operand.hbm [shape: f32[2,16,32], index: 6, kind: output, shape index: {0}]   ;;  %s5619_s7 = inlined_call_operand.hbm [shape: f32[2,8,16,16], index: 7, kind: output, shape index: {1}]  }
   0x1   :  { %5624 = sst [smem:[#allocation15_spill]] %s5612_s0 }
   0x2   :  { %5625 = sst [smem:[#allocation16_spill]] %s5613_s1 }
   0x3   :  { %13 = vsyncpa [#allocation5], 0 }
   0x4   :  { %15 = vsyncpa [#allocation5 + $0x1], 0 }
   0x5   :  { %16 = vsyncpa [#allocation7], 0 }
   0x6   :  { %18 = vsyncpa [#allocation7 + $0x1], 0  ;;  %s4796_s24 = smov 0   ;;  %s4798_s25 = smov 0  }
   0x7   :  { %s4800_s26 = smov 0   ;;  %s4802_s27 = smov 0  }
   0x8   :  { %s4804_s28 = smov 0   ;;  %s4806_s29 = smov 0  }
   0x9   :  { %s4808_s30 = smov 0   ;;  %s4810_s8 = smov 0  }
   0xa LB: > { %5626 = sst [smem:[#allocation10_spill]] %s4733_s29  ;;  %s3830_s9 = sadd.s32 4294967295, %s4741_s8   ;;  %s4741_s8 = sphi %s4810_s8, %s24_s8   ;;  %s4737_s30 = sphi %s4808_s30, %s5639_s30   ;;  %s4733_s29 = sphi %s4806_s29, %s5638_s29   ;;  %s4729_s28 = sphi %s4804_s28, %s5637_s28   ;;  %s4725_s27 = sphi %s4802_s27, %s5636_s27   ;;  %s4721_s26 = sphi %s4800_s26, %s5642_s26   ;;  %s4717_s25 = sphi %s4798_s25, %s5641_s25   ;;  %s4713_s24 = sphi %s4796_s24, %s5640_s24  }
   0xb   : > { %5627 = sst [smem:[#allocation11_spill]] %s4737_s30  ;;  %s3831_s10 = sadd.s32 4294967294, %s4741_s8  }
   0xc   : > { %s33_s11 = sadd.s32 1, %s4733_s29  ;;  %s36_s12 = sadd.s32 1, %s4737_s30 }
   0xd   : > { %p34_p0 = scmp.ge.s32.totalorder %s33_s11, 2  ;;  %p186_p1 = scmp.ne.s32.totalorder %s4721_s26, %s4717_s25 }
   0xe   : > { %p187_p2 = scmp.eq.s32.totalorder %s3830_s9, 3  ;;  %p192_p5 = scmp.ne.s32.totalorder %s4717_s25, %s4713_s24 }
   0xf   : > { %s5644_s11 = smov (%p34_p0, %s33_s11), 0  ;;  %s5646_s12 = smov (!%p34_p0, %s36_s12), %s4737_s30 }
  0x10   : > { %5628 = sst [smem:[#allocation12_spill]] %s5644_s11  ;;  %s172_s13 = ssub.s32 %s4733_s29, %s5644_s11 }
  0x11   : > { %p4847_p3 = por %p187_p2, %p186_p1  ;;  %p38_p4 = scmp.ge.s32.totalorder %s5646_s12, 2 }
  0x12   : > { %p193_p6 = scmp.eq.s32.totalorder %s3831_s10, 3  ;;  %p3834_p7 = scmp.ge.s32.totalorder %s4741_s8, 1 }
  0x13   : > { %s5648_s12 = smov (%p38_p4, %s5646_s12), 0  ;;  %p262_p9 = scmp.lt.s32.totalorder %s4741_s8, 5 }
  0x14   : > { %5630 = sst [smem:[#allocation13_spill]] %s5648_s12  ;;  %p4856_p8 = por %p193_p6, %p192_p5 }
  0x15   : > { %s171_s16 = ssub.s32 %s4737_s30, %s5648_s12  ;;  %s176_s17 = sadd.s32 1, %s4721_s26 }
  0x16   : > { %s173_s18 = sor.u32 %s172_s13, %s171_s16  ;;  %p263_p10 = pnand %p3834_p7, %p262_p9 }
  0x17   : > { %p174_p11 = scmp.eq.s32.totalorder %s173_s18, 0  ;;  %s4868_s20 = sand.u32 (!%p263_p10), 1, %s4717_s25  }
  0x18   : > { %266 = sbr.rel (%p263_p10) target bundleno = 1576 (0x628), region = 44  ;;  %p299_p12 = scmp.lt.s32.totalorder (!%p263_p10), %s4729_s28, 1 }
  0x19   : > { %s4865_s19 = scalar_select %p174_p11, %s4721_s26, %s176_s17  }
  0x1a   : > { %s3835_s21 = sshll.u32 (!%p263_p10), %s4868_s20, 3  ;;  %s3836_s22 = sshll.u32 (!%p263_p10), %s4868_s20, 6 }
  0x1b   : > { %5632 = sst [smem:[#allocation14_spill]] %s4865_s19  ;;  %s4879_s16 = scalar_lea.vmem (!%p263_p10), [#allocation4], %s3835_s21 }
  0x1c   : > { %s5633_s0 = sld [smem:[#allocation15_spill]] (!%p263_p10)  ;;  %s4881_s17 = scalar_lea.vmem (!%p263_p10), [#allocation6], %s3836_s22 }
  0x1d   : > { %s300_s23 = scalar_select %p299_p12, %s4729_s28, 1 }
  0x1e   : > { %p3839_p13 = scmp.ne.s32.totalorder %s4725_s27, 0 }
  0x1f   : > { %s3923_s9 = sshll.u32 %s300_s23, 4 }
  0x20   : > { %307 = sbr.rel (%p3839_p13) target bundleno = 314 (0x13a), region = 48 }
  0x22   : > { %s4877_s13 = scalar_lea.vmem %s5633_s0, %s3923_s9 }
  0x25   : > { %v313_v0 = vld [vmem:[%s5614_s2 + $0x18] sm:$0xff]  ;;  %v312_v2 = vld [vmem:[%s5614_s2 + $0x10] sm:$0xff]  ;;  %v311_v4 = vld [vmem:[%s5614_s2 + $0x8] sm:$0xff]  ;;  %vm342_vm0 = vcmask 261120   ;;  %vm949_vm1 = vcmask 31744  }
  0x26   : > { %v317_v1 = vld [vmem:[%s5614_s2 + $0x38] sm:$0xff]  ;;  %4113 = vmatprep.subr.mxu0 %v313_v0  ;;  %v316_v3 = vld [vmem:[%s5614_s2 + $0x30] sm:$0xff]  ;;  %v315_v5 = vld [vmem:[%s5614_s2 + $0x28] sm:$0xff] }
  0x27   : > { %4124 = vmatprep.subr.mxu1 %v317_v1  ;;  %4114 = vmatpush3.msra.mxu0 %v313_v0  ;;  %v310_v6 = vld [vmem:[%s5614_s2] sm:$0xff]  ;;  %v4912_v9 = vld [vmem:[%s4877_s13 + $0x8] sm:$0xff]  ;;  %v321_v10 = vld [vmem:[%s5614_s2 + $0x58] sm:$0xff] }
  0x28   : > { %4125 = vmatpush3.msra.mxu1 %v317_v1  ;;  %4115 = vmatprep.subr.mxu0 %v312_v2  ;;  %v314_v7 = vld [vmem:[%s5614_s2 + $0x20] sm:$0xff]  ;;  %v325_v11 = vld [vmem:[%s5614_s2 + $0x78] sm:$0xff]  ;;  %v320_v12 = vld [vmem:[%s5614_s2 + $0x50] sm:$0xff] }
  0x29   : > { %4126 = vmatprep.subr.mxu1 %v316_v3  ;;  %4116 = vmatpush3.msra.mxu0 %v312_v2  ;;  %v4909_v8 = vld [vmem:[%s4877_s13] sm:$0xff]  ;;  %v324_v13 = vld [vmem:[%s5614_s2 + $0x70] sm:$0xff]  ;;  %v319_v14 = vld [vmem:[%s5614_s2 + $0x48] sm:$0xff] }
  0x2a   : > { %4127 = vmatpush3.msra.mxu1 %v316_v3  ;;  %4117 = vmatprep.subr.mxu0 %v311_v4  ;;  %v323_v15 = vld [vmem:[%s5614_s2 + $0x68] sm:$0xff]  ;;  %v318_v16 = vld [vmem:[%s5614_s2 + $0x40] sm:$0xff]  ;;  %v329_v18 = vld [vmem:[%s5614_s2 + $0x98] sm:$0xff] }
  0x2b   : > { %4128 = vmatprep.subr.mxu1 %v315_v5  ;;  %4118 = vmatpush3.msra.mxu0 %v311_v4  ;;  %v322_v17 = vld [vmem:[%s5614_s2 + $0x60] sm:$0xff]  ;;  %v333_v19 = vld [vmem:[%s5614_s2 + $0xb8] sm:$0xff]  ;;  %v328_v20 = vld [vmem:[%s5614_s2 + $0x90] sm:$0xff] }
  0x2c   : > { %4129 = vmatpush3.msra.mxu1 %v315_v5  ;;  %4119 = vmatprep.subr.mxu0 %v310_v6  ;;  %v332_v21 = vld [vmem:[%s5614_s2 + $0xb0] sm:$0xff]  ;;  %v327_v22 = vld [vmem:[%s5614_s2 + $0x88] sm:$0xff]  ;;  %v326_v24 = vld [vmem:[%s5614_s2 + $0x80] sm:$0xff] }
  0x2d   : > { %4130 = vmatprep.subr.mxu1 %v314_v7  ;;  %4120 = vmatpush3.msra.mxu0 %v310_v6  ;;  %v331_v23 = vld [vmem:[%s5614_s2 + $0xa8] sm:$0xff]  ;;  %v330_v25 = vld [vmem:[%s5614_s2 + $0xa0] sm:$0xff]  ;;  %v337_v26 = vld [vmem:[%s5614_s2 + $0xd8] sm:$0xff] }
  0x2e   : > { %4121 = vmatprep.mubr.msk.f32.mxu0 %vm342_vm0, %v4909_v8  ;;  %4131 = vmatpush3.msra.mxu1 %v314_v7  ;;  %v341_v27 = vld [vmem:[%s5614_s2 + $0xf8] sm:$0xff]  ;;  %v336_v28 = vld [vmem:[%s5614_s2 + $0xd0] sm:$0xff]  ;;  %v335_v30 = vld [vmem:[%s5614_s2 + $0xc8] sm:$0xff] }
  0x2f   : > { %4132 = vmatprep.mubr.msk.f32.mxu1 %vm342_vm0, %v4909_v8  ;;  %4122 = vmatmul.mubr.msk.f32.vlgmr.msra.gmra.mxu0 %vm342_vm0, %v4912_v9  ;;  %v340_v29 = vld [vmem:[%s5614_s2 + $0xf0] sm:$0xff]  ;;  %v339_v31 = vld [vmem:[%s5614_s2 + $0xe8] sm:$0xff]  ;;  %v334_v32 = vld [vmem:[%s5614_s2 + $0xc0] sm:$0xff] }
  0x30   : > { %4133 = vmatmul.mubr.msk.f32.vlgmr.msra.gmra.mxu1 %vm342_vm0, %v4912_v9  ;;  %4135 = vmatprep.subr.mxu0 %v321_v10  ;;  %v338_v33 = vld [vmem:[%s5614_s2 + $0xe0] sm:$0xff]  ;;  %v969_v34 = vld [vmem:[%s5615_s3 + $0x18] sm:$0xff]  ;;  %v968_v36 = vld [vmem:[%s5615_s3 + $0x10] sm:$0xff] }
  0x31   : > { %4146 = vmatprep.subr.mxu1 %v325_v11  ;;  %4136 = vmatpush3.msra.mxu0 %v321_v10  ;;  %v973_v35 = vld [vmem:[%s5615_s3 + $0x38] sm:$0xff]  ;;  %v972_v37 = vld [vmem:[%s5615_s3 + $0x30] sm:$0xff]  ;;  %v967_v38 = vld [vmem:[%s5615_s3 + $0x8] sm:$0xff] }
  0x32   : > { %4147 = vmatpush3.msra.mxu1 %v325_v11  ;;  %4137 = vmatprep.subr.mxu0 %v320_v12  ;;  %v971_v39 = vld [vmem:[%s5615_s3 + $0x28] sm:$0xff]  ;;  %v966_v40 = vld [vmem:[%s5615_s3] sm:$0xff]  ;;  %v977_v42 = vld [vmem:[%s5615_s3 + $0x58] sm:$0xff] }
  0x33   : > { %4148 = vmatprep.subr.mxu1 %v324_v13  ;;  %4138 = vmatpush3.msra.mxu0 %v320_v12  ;;  %v970_v41 = vld [vmem:[%s5615_s3 + $0x20] sm:$0xff]  ;;  %v981_v43 = vld [vmem:[%s5615_s3 + $0x78] sm:$0xff]  ;;  %v976_v44 = vld [vmem:[%s5615_s3 + $0x50] sm:$0xff] }
  0x34   : > { %4149 = vmatpush3.msra.mxu1 %v324_v13  ;;  %4139 = vmatprep.subr.mxu0 %v319_v14  ;;  %v980_v45 = vld [vmem:[%s5615_s3 + $0x70] sm:$0xff]  ;;  %v975_v46 = vld [vmem:[%s5615_s3 + $0x48] sm:$0xff]  ;;  %v974_v48 = vld [vmem:[%s5615_s3 + $0x40] sm:$0xff] }
  0x35   : > { %4150 = vmatprep.subr.mxu1 %v323_v15  ;;  %4140 = vmatpush3.msra.mxu0 %v319_v14  ;;  %v979_v47 = vld [vmem:[%s5615_s3 + $0x68] sm:$0xff]  ;;  %v978_v49 = vld [vmem:[%s5615_s3 + $0x60] sm:$0xff]  ;;  %v985_v50 = vld [vmem:[%s5615_s3 + $0x98] sm:$0xff] }
  0x36   : > { %4151 = vmatpush3.msra.mxu1 %v323_v15  ;;  %4141 = vmatprep.subr.mxu0 %v318_v16  ;;  %v989_v51 = vld [vmem:[%s5615_s3 + $0xb8] sm:$0xff]  ;;  %v984_v52 = vld [vmem:[%s5615_s3 + $0x90] sm:$0xff]  ;;  %v983_v54 = vld [vmem:[%s5615_s3 + $0x88] sm:$0xff] }
  0x37   : > { %4152 = vmatprep.subr.mxu1 %v322_v17  ;;  %4142 = vmatpush3.msra.mxu0 %v318_v16  ;;  %v988_v53 = vld [vmem:[%s5615_s3 + $0xb0] sm:$0xff]  ;;  %v987_v55 = vld [vmem:[%s5615_s3 + $0xa8] sm:$0xff]  ;;  %v982_v56 = vld [vmem:[%s5615_s3 + $0x80] sm:$0xff] }
  0x38   : > { %4143 = vmatprep.mubr.msk.f32.mxu0 %vm342_vm0, %v4909_v8  ;;  %4153 = vmatpush3.msra.mxu1 %v322_v17  ;;  %v986_v57 = vld [vmem:[%s5615_s3 + $0xa0] sm:$0xff]  ;;  %v993_v58 = vld [vmem:[%s5615_s3 + $0xd8] sm:$0xff]  ;;  %v992_v60 = vld [vmem:[%s5615_s3 + $0xd0] sm:$0xff] }
  0x39   : > { %4154 = vmatprep.mubr.msk.f32.mxu1 %vm342_vm0, %v4909_v8  ;;  %4144 = vmatmul.mubr.msk.f32.vlgmr.msra.gmra.mxu0 %vm342_vm0, %v4912_v9  ;;  %v997_v59 = vld [vmem:[%s5615_s3 + $0xf8] sm:$0xff]  ;;  %v996_v61 = vld [vmem:[%s5615_s3 + $0xf0] sm:$0xff]  ;;  %v991_v62 = vld [vmem:[%s5615_s3 + $0xc8] sm:$0xff] }
  0x3a   : > { %4155 = vmatmul.mubr.msk.f32.vlgmr.msra.gmra.mxu1 %vm342_vm0, %v4912_v9  ;;  %4157 = vmatprep.subr.mxu0 %v329_v18  ;;  %v995_v63 = vld [vmem:[%s5615_s3 + $0xe8] sm:$0xff]  ;;  %v990_v0 = vld [vmem:[%s5615_s3 + $0xc0] sm:$0xff] }
  0x3b   : > { %4168 = vmatprep.subr.mxu1 %v333_v19  ;;  %4158 = vmatpush3.msra.mxu0 %v329_v18  ;;  %v994_v1 = vld [vmem:[%s5615_s3 + $0xe0] sm:$0xff] }
  0x3c   : > { %4169 = vmatpush3.msra.mxu1 %v333_v19  ;;  %4159 = vmatprep.subr.mxu0 %v328_v20 }
  0x3d   : > { %4170 = vmatprep.subr.mxu1 %v332_v21  ;;  %4160 = vmatpush3.msra.mxu0 %v328_v20 }
  0x3e   : > { %4171 = vmatpush3.msra.mxu1 %v332_v21  ;;  %4161 = vmatprep.subr.mxu0 %v327_v22 }
  0x3f   : > { %4172 = vmatprep.subr.mxu1 %v331_v23  ;;  %4162 = vmatpush3.msra.mxu0 %v327_v22 }
  0x40   : > { %4173 = vmatpush3.msra.mxu1 %v331_v23  ;;  %4163 = vmatprep.subr.mxu0 %v326_v24 }
  0x41   : > { %4174 = vmatprep.subr.mxu1 %v330_v25  ;;  %4164 = vmatpush3.msra.mxu0 %v326_v24 }
  0x42   : > { %4165 = vmatprep.mubr.msk.f32.mxu0 %vm342_vm0, %v4909_v8  ;;  %4175 = vmatpush3.msra.mxu1 %v330_v25 }
  0x43   : > { %4176 = vmatprep.mubr.msk.f32.mxu1 %vm342_vm0, %v4909_v8  ;;  %4166 = vmatmul.mubr.msk.f32.vlgmr.msra.gmra.mxu0 %vm342_vm0, %v4912_v9 }
  0x44   : > { %4177 = vmatmul.mubr.msk.f32.vlgmr.msra.gmra.mxu1 %vm342_vm0, %v4912_v9  ;;  %4179 = vmatprep.subr.mxu0 %v337_v26 }
  0x45   : > { %4190 = vmatprep.subr.mxu1 %v341_v27  ;;  %4180 = vmatpush3.msra.mxu0 %v337_v26 }
  0x46   : > { %4191 = vmatpush3.msra.mxu1 %v341_v27  ;;  %4181 = vmatprep.subr.mxu0 %v336_v28 }
  0x47   : > { %4192 = vmatprep.subr.mxu1 %v340_v29  ;;  %4182 = vmatpush3.msra.mxu0 %v336_v28 }
  0x48   : > { %4193 = vmatpush3.msra.mxu1 %v340_v29  ;;  %4183 = vmatprep.subr.mxu0 %v335_v30 }
  0x49   : > { %4194 = vmatprep.subr.mxu1 %v339_v31  ;;  %4184 = vmatpush3.msra.mxu0 %v335_v30 }
  0x4a   : > { %4195 = vmatpush3.msra.mxu1 %v339_v31  ;;  %4185 = vmatprep.subr.mxu0 %v334_v32 }
  0x4b   : > { %4196 = vmatprep.subr.mxu1 %v338_v33  ;;  %4186 = vmatpush3.msra.mxu0 %v334_v32 }
  0x4c   : > { %4187 = vmatprep.mubr.msk.f32.mxu0 %vm342_vm0, %v4909_v8  ;;  %4197 = vmatpush3.msra.mxu1 %v338_v33 }
  0x4d   : > { %4198 = vmatprep.mubr.msk.f32.mxu1 %vm342_vm0, %v4909_v8  ;;  %4188 = vmatmul.mubr.msk.f32.vlgmr.msra.gmra.mxu0 %vm342_vm0, %v4912_v9 }
  0x4e   : > { %4199 = vmatmul.mubr.msk.f32.vlgmr.msra.gmra.mxu1 %vm342_vm0, %v4912_v9  ;;  %4201 = vmatprep.subr.mxu0 %v969_v34 }
  0x4f   : > { %4212 = vmatprep.subr.mxu1 %v973_v35  ;;  %4202 = vmatpush3.msra.mxu0 %v969_v34 }
  0x50   : > { %4213 = vmatpush3.msra.mxu1 %v973_v35  ;;  %4203 = vmatprep.subr.mxu0 %v968_v36 }
  0x51   : > { %4214 = vmatprep.subr.mxu1 %v972_v37  ;;  %4204 = vmatpush3.msra.mxu0 %v968_v36 }
  0x52   : > { %4215 = vmatpush3.msra.mxu1 %v972_v37  ;;  %4205 = vmatprep.subr.mxu0 %v967_v38 }
  0x53   : > { %4216 = vmatprep.subr.mxu1 %v971_v39  ;;  %4206 = vmatpush3.msra.mxu0 %v967_v38 }
  0x54   : > { %4217 = vmatpush3.msra.mxu1 %v971_v39  ;;  %4207 = vmatprep.subr.mxu0 %v966_v40 }
  0x55   : > { %4218 = vmatprep.subr.mxu1 %v970_v41  ;;  %4208 = vmatpush3.msra.mxu0 %v966_v40 }
  0x56   : > { %4209 = vmatprep.mubr.msk.f32.mxu0 %vm342_vm0, %v4909_v8  ;;  %4219 = vmatpush3.msra.mxu1 %v970_v41 }
  0x57   : > { %4220 = vmatprep.mubr.msk.f32.mxu1 %vm342_vm0, %v4909_v8  ;;  %4210 = vmatmul.mubr.msk.f32.vlgmr.msra.gmra.mxu0 %vm342_vm0, %v4912_v9 }
  0x58   : > { %4221 = vmatmul.mubr.msk.f32.vlgmr.msra.gmra.mxu1 %vm342_vm0, %v4912_v9  ;;  %4223 = vmatprep.subr.mxu0 %v977_v42 }
  0x59   : > { %4234 = vmatprep.subr.mxu1 %v981_v43  ;;  %4224 = vmatpush3.msra.mxu0 %v977_v42 }
  0x5a   : > { %4235 = vmatpush3.msra.mxu1 %v981_v43  ;;  %4225 = vmatprep.subr.mxu0 %v976_v44 }
  0x5b   : > { %4236 = vmatprep.subr.mxu1 %v980_v45  ;;  %4226 = vmatpush3.msra.mxu0 %v976_v44 }
  0x5c   : > { %4237 = vmatpush3.msra.mxu1 %v980_v45  ;;  %4227 = vmatprep.subr.mxu0 %v975_v46 }
  0x5d   : > { %4238 = vmatprep.subr.mxu1 %v979_v47  ;;  %4228 = vmatpush3.msra.mxu0 %v975_v46 }
  0x5e   : > { %4239 = vmatpush3.msra.mxu1 %v979_v47  ;;  %4229 = vmatprep.subr.mxu0 %v974_v48 }
  0x5f   : > { %4240 = vmatprep.subr.mxu1 %v978_v49  ;;  %4230 = vmatpush3.msra.mxu0 %v974_v48 }
  0x60   : > { %4231 = vmatprep.mubr.msk.f32.mxu0 %vm342_vm0, %v4909_v8  ;;  %4241 = vmatpush3.msra.mxu1 %v978_v49 }
  0x61   : > { %4242 = vmatprep.mubr.msk.f32.mxu1 %vm342_vm0, %v4909_v8  ;;  %4232 = vmatmul.mubr.msk.f32.vlgmr.msra.gmra.mxu0 %vm342_vm0, %v4912_v9 }
  0x62   : > { %4243 = vmatmul.mubr.msk.f32.vlgmr.msra.gmra.mxu1 %vm342_vm0, %v4912_v9  ;;  %4245 = vmatprep.subr.mxu0 %v985_v50 }
  0x63   : > { %4256 = vmatprep.subr.mxu1 %v989_v51  ;;  %4246 = vmatpush3.msra.mxu0 %v985_v50 }
  0x64   : > { %4257 = vmatpush3.msra.mxu1 %v989_v51  ;;  %4247 = vmatprep.subr.mxu0 %v984_v52 }
  0x65   : > { %4258 = vmatprep.subr.mxu1 %v988_v53  ;;  %4248 = vmatpush3.msra.mxu0 %v984_v52 }
  0x66   : > { %4259 = vmatpush3.msra.mxu1 %v988_v53  ;;  %4249 = vmatprep.subr.mxu0 %v983_v54 }
  0x67   : > { %4260 = vmatprep.subr.mxu1 %v987_v55  ;;  %4250 = vmatpush3.msra.mxu0 %v983_v54 }
  0x68   : > { %4261 = vmatpush3.msra.mxu1 %v987_v55  ;;  %4251 = vmatprep.subr.mxu0 %v982_v56 }
  0x69   : > { %4262 = vmatprep.subr.mxu1 %v986_v57  ;;  %4252 = vmatpush3.msra.mxu0 %v982_v56 }
  0x6a   : > { %4253 = vmatprep.mubr.msk.f32.mxu0 %vm342_vm0, %v4909_v8  ;;  %4263 = vmatpush3.msra.mxu1 %v986_v57 }
  0x6b   : > { %4264 = vmatprep.mubr.msk.f32.mxu1 %vm342_vm0, %v4909_v8  ;;  %4254 = vmatmul.mubr.msk.f32.vlgmr.msra.gmra.mxu0 %vm342_vm0, %v4912_v9 }
  0x6c   : > { %4265 = vmatmul.mubr.msk.f32.vlgmr.msra.gmra.mxu1 %vm342_vm0, %v4912_v9  ;;  %4267 = vmatprep.subr.mxu0 %v993_v58 }
  0x6d   : > { %4278 = vmatprep.subr.mxu1 %v997_v59  ;;  %4268 = vmatpush3.msra.mxu0 %v993_v58 }
  0x6e   : > { %4279 = vmatpush3.msra.mxu1 %v997_v59  ;;  %4269 = vmatprep.subr.mxu0 %v992_v60 }
  0x6f   : > { %4280 = vmatprep.subr.mxu1 %v996_v61  ;;  %4270 = vmatpush3.msra.mxu0 %v992_v60 }
  0x70   : > { %4281 = vmatpush3.msra.mxu1 %v996_v61  ;;  %4271 = vmatprep.subr.mxu0 %v991_v62 }
  0x71   : > { %4282 = vmatprep.subr.mxu1 %v995_v63  ;;  %4272 = vmatpush3.msra.mxu0 %v991_v62 }
  0x72   : > { %4283 = vmatpush3.msra.mxu1 %v995_v63  ;;  %4273 = vmatprep.subr.mxu0 %v990_v0 }
  0x73   : > { %4284 = vmatprep.subr.mxu1 %v994_v1  ;;  %4274 = vmatpush3.msra.mxu0 %v990_v0 }
  0x74   : > { %4275 = vmatprep.mubr.msk.f32.mxu0 %vm342_vm0, %v4909_v8  ;;  %4285 = vmatpush3.msra.mxu1 %v994_v1 }
  0x75   : > { %4286 = vmatprep.mubr.msk.f32.mxu1 %vm342_vm0, %v4909_v8  ;;  %4276 = vmatmul.mubr.msk.f32.vlgmr.msra.gmra.mxu0 %vm342_vm0, %v4912_v9 }
  0x76   : > { %4287 = vmatmul.mubr.msk.f32.vlgmr.msra.gmra.mxu1 %vm342_vm0, %v4912_v9 }
  0xef   : > { %v4123_v2 = vpop.f32.mrf.mxu0 }
  0xf0   : > { %v4134_v3 = vpop.f32.mrf.mxu1  ;;  %951 = vst.msk [vmem:[#allocation2 + $0x8] sm:$0xff] %vm949_vm1, %v4123_v2 }
  0xf1   : > { %953 = vst.msk [vmem:[#allocation2 + $0x18] sm:$0xff] %vm949_vm1, %v4134_v3  ;;  %v415_v4 = vpop.f32.mrf.mxu0 }
  0xf2   : > { %v490_v5 = vpop.f32.mrf.mxu1  ;;  %950 = vst.msk [vmem:[#allocation2] sm:$0xff] %vm949_vm1, %v415_v4 }
  0xf3   : > { %952 = vst.msk [vmem:[#allocation2 + $0x10] sm:$0xff] %vm949_vm1, %v490_v5 }
  0xf9   : > { %v4145_v6 = vpop.f32.mrf.mxu0 }
  0xfa   : > { %v4156_v7 = vpop.f32.mrf.mxu1  ;;  %955 = vst.msk [vmem:[#allocation2 + $0x28] sm:$0xff] %vm949_vm1, %v4145_v6 }
  0xfb   : > { %957 = vst.msk [vmem:[#allocation2 + $0x38] sm:$0xff] %vm949_vm1, %v4156_v7  ;;  %v565_v8 = vpop.f32.mrf.mxu0 }
  0xfc   : > { %v640_v9 = vpop.f32.mrf.mxu1  ;;  %954 = vst.msk [vmem:[#allocation2 + $0x20] sm:$0xff] %vm949_vm1, %v565_v8 }
  0xfd   : > { %956 = vst.msk [vmem:[#allocation2 + $0x30] sm:$0xff] %vm949_vm1, %v640_v9 }
 0x103   : > { %v4167_v10 = vpop.f32.mrf.mxu0 }
 0x104   : > { %v4178_v11 = vpop.f32.mrf.mxu1  ;;  %959 = vst.msk [vmem:[#allocation2 + $0x48] sm:$0xff] %vm949_vm1, %v4167_v10 }
 0x105   : > { %961 = vst.msk [vmem:[#allocation2 + $0x58] sm:$0xff] %vm949_vm1, %v4178_v11  ;;  %v715_v12 = vpop.f32.mrf.mxu0 }
 0x106   : > { %v790_v13 = vpop.f32.mrf.mxu1  ;;  %958 = vst.msk [vmem:[#allocation2 + $0x40] sm:$0xff] %vm949_vm1, %v715_v12 }
 0x107   : > { %960 = vst.msk [vmem:[#allocation2 + $0x50] sm:$0xff] %vm949_vm1, %v790_v13 }
 0x10d   : > { %v4189_v14 = vpop.f32.mrf.mxu0 }
 0x10e   : > { %v4200_v15 = vpop.f32.mrf.mxu1  ;;  %963 = vst.msk [vmem:[#allocation2 + $0x68] sm:$0xff] %vm949_vm1, %v4189_v14 }
 0x10f   : > { %965 = vst.msk [vmem:[#allocation2 + $0x78] sm:$0xff] %vm949_vm1, %v4200_v15  ;;  %v865_v16 = vpop.f32.mrf.mxu0 }
 0x110   : > { %v940_v17 = vpop.f32.mrf.mxu1  ;;  %962 = vst.msk [vmem:[#allocation2 + $0x60] sm:$0xff] %vm949_vm1, %v865_v16 }
 0x111   : > { %964 = vst.msk [vmem:[#allocation2 + $0x70] sm:$0xff] %vm949_vm1, %v940_v17 }
 0x117   : > { %v4211_v18 = vpop.f32.mrf.mxu0 }
 0x118   : > { %v4222_v19 = vpop.f32.mrf.mxu1  ;;  %1599 = vst.msk [vmem:[#allocation3 + $0x8] sm:$0xff] %vm949_vm1, %v4211_v18 }
 0x119   : > { %1601 = vst.msk [vmem:[#allocation3 + $0x18] sm:$0xff] %vm949_vm1, %v4222_v19  ;;  %v1064_v20 = vpop.f32.mrf.mxu0 }
 0x11a   : > { %v1139_v21 = vpop.f32.mrf.mxu1  ;;  %1598 = vst.msk [vmem:[#allocation3] sm:$0xff] %vm949_vm1, %v1064_v20 }
 0x11b   : > { %1600 = vst.msk [vmem:[#allocation3 + $0x10] sm:$0xff] %vm949_vm1, %v1139_v21 }
 0x121   : > { %v4233_v22 = vpop.f32.mrf.mxu0 }
 0x122   : > { %v4244_v23 = vpop.f32.mrf.mxu1  ;;  %1603 = vst.msk [vmem:[#allocation3 + $0x28] sm:$0xff] %vm949_vm1, %v4233_v22 }
 0x123   : > { %1605 = vst.msk [vmem:[#allocation3 + $0x38] sm:$0xff] %vm949_vm1, %v4244_v23  ;;  %v1214_v24 = vpop.f32.mrf.mxu0 }
 0x124   : > { %v1289_v25 = vpop.f32.mrf.mxu1  ;;  %1602 = vst.msk [vmem:[#allocation3 + $0x20] sm:$0xff] %vm949_vm1, %v1214_v24 }
 0x125   : > { %1604 = vst.msk [vmem:[#allocation3 + $0x30] sm:$0xff] %vm949_vm1, %v1289_v25 }
 0x12b   : > { %v4255_v26 = vpop.f32.mrf.mxu0 }
 0x12c   : > { %v4266_v27 = vpop.f32.mrf.mxu1  ;;  %1607 = vst.msk [vmem:[#allocation3 + $0x48] sm:$0xff] %vm949_vm1, %v4255_v26 }
 0x12d   : > { %1609 = vst.msk [vmem:[#allocation3 + $0x58] sm:$0xff] %vm949_vm1, %v4266_v27  ;;  %v1364_v28 = vpop.f32.mrf.mxu0 }
 0x12e   : > { %v1439_v29 = vpop.f32.mrf.mxu1  ;;  %1606 = vst.msk [vmem:[#allocation3 + $0x40] sm:$0xff] %vm949_vm1, %v1364_v28 }
 0x12f   : > { %1608 = vst.msk [vmem:[#allocation3 + $0x50] sm:$0xff] %vm949_vm1, %v1439_v29 }
 0x135   : > { %v4277_v30 = vpop.f32.mrf.mxu0 }
 0x136   : > { %v4288_v31 = vpop.f32.mrf.mxu1  ;;  %1611 = vst.msk [vmem:[#allocation3 + $0x68] sm:$0xff] %vm949_vm1, %v4277_v30 }
 0x137   : > { %1613 = vst.msk [vmem:[#allocation3 + $0x78] sm:$0xff] %vm949_vm1, %v4288_v31  ;;  %v1514_v32 = vpop.f32.mrf.mxu0 }
 0x138   : > { %v1589_v33 = vpop.f32.mrf.mxu1  ;;  %1610 = vst.msk [vmem:[#allocation3 + $0x60] sm:$0xff] %vm949_vm1, %v1514_v32 }
 0x139   : > { %1612 = vst.msk [vmem:[#allocation3 + $0x70] sm:$0xff] %vm949_vm1, %v1589_v33 }
 0x13a PF: > { %s5634_s1 = sld [smem:[#allocation16_spill]]  ;;  %v4743_v36 = vmov 0.0   ;;  %s3872_s18 = sshll.u32 %s4725_s27, 3  ;;  %vm1649_vm2 = vcmask 261120   ;;  %vm4744_vm3 = vmmov 0   ;;  %v2214_v4 = vld [vmem:[#allocation2 + $0x8] sm:$0xff] }
 0x13b   : > { %4289 = vmatprep.subr.mxu0 %v4743_v36  ;;  %4300 = vmatprep.subr.mxu1 %v4743_v36  ;;  %s1615_s11 = scalar_lea.vmem %s4877_s13, %s3872_s18  ;;  %vm2229_vm4 = vcmask 31744   ;;  %v2216_v5 = vld [vmem:[#allocation2 + $0x18] sm:$0xff]  ;;  %v2213_v6 = vld [vmem:[#allocation2] sm:$0xff]  ;;  %v2215_v7 = vld [vmem:[#allocation2 + $0x10] sm:$0xff]  ;;  %vm2862_vm5 = vcmask 130048   ;;  %s4745_s13 = smov 4  }
 0x13c   : > { %v5212_v43 = vld [vmem:[%s1615_s11] sm:$0xff]  ;;  %4297 = vmatprep.mubr.msk.f32.mxu0 %vm4744_vm3, %v4743_v36  ;;  %4308 = vmatprep.mubr.msk.f32.mxu1 %vm4744_vm3, %v4743_v36  ;;  %v2218_v8 = vld [vmem:[#allocation2 + $0x28] sm:$0xff]  ;;  %v2220_v9 = vld [vmem:[#allocation2 + $0x38] sm:$0xff]  ;;  %s4746_s21 = smov 8   ;;  %s4747_s9 = smov 12   ;;  %vm3588_vm6 = vcmask 64512  }
 0x13d   : > { %v2217_v14 = vld [vmem:[#allocation2 + $0x20] sm:$0xff]  ;;  %v2219_v15 = vld [vmem:[#allocation2 + $0x30] sm:$0xff]  ;;  %v2222_v16 = vld [vmem:[#allocation2 + $0x48] sm:$0xff]  ;;  %s4748_s19 = smov 20   ;;  %s4750_s10 = smov 28   ;;  %vm3590_vm7 = vcmask 97280  }
 0x13e   : > { %v2224_v17 = vld [vmem:[#allocation2 + $0x58] sm:$0xff]  ;;  %v2221_v22 = vld [vmem:[#allocation2 + $0x40] sm:$0xff]  ;;  %v2223_v23 = vld [vmem:[#allocation2 + $0x50] sm:$0xff]  ;;  %s4751_s18 = smov 24   ;;  %vm3593_vm8 = vcmask 162816   ;;  %vm3595_vm9 = vcmask 195584  }
 0x13f   : > { %v2226_v24 = vld [vmem:[#allocation2 + $0x68] sm:$0xff]  ;;  %v2228_v25 = vld [vmem:[#allocation2 + $0x78] sm:$0xff]  ;;  %v2225_v30 = vld [vmem:[#allocation2 + $0x60] sm:$0xff]  ;;  %vm3597_vm10 = vcmask 228352   ;;  %s3919_s23 = sshll.u32 %s4729_s28, 4  ;;  %s3719_s11 = sshll.u32 %s4881_s17, 4  ;;  %s5528_s11 = int_to_ptr.vmem [resolvable:$true] %s3719_s11 }
 0x140   : > { %v1620_v34 = vld [vmem:[%s5634_s1 + $0x18] sm:$0xff]  ;;  %v1619_v37 = vld [vmem:[%s5634_s1 + $0x10] sm:$0xff]  ;;  %v1618_v39 = vld [vmem:[%s5634_s1 + $0x8] sm:$0xff]  ;;  %s3716_s12 = sadd.s32 %s4725_s27, %s3919_s23 }
 0x141   : > { %v1624_v35 = vld [vmem:[%s5634_s1 + $0x38] sm:$0xff]  ;;  %v1623_v38 = vld [vmem:[%s5634_s1 + $0x30] sm:$0xff]  ;;  %4290 = vmatpush3.msra.mxu0 %v1620_v34  ;;  %v1622_v40 = vld [vmem:[%s5634_s1 + $0x28] sm:$0xff]  ;;  %s3920_s22 = sshll.u32 %s3716_s12, 7 }
 0x142   : > { %4301 = vmatpush3.msra.mxu1 %v1624_v35  ;;  %4291 = vmatprep.subr.mxu0 %v4743_v36  ;;  %v1617_v41 = vld [vmem:[%s5634_s1] sm:$0xff]  ;;  %v1628_v44 = vld [vmem:[%s5634_s1 + $0x58] sm:$0xff]  ;;  %v1627_v46 = vld [vmem:[%s5634_s1 + $0x50] sm:$0xff]  ;;  %s5526_s30 = scalar_lea.hbm %s5619_s7, %s3920_s22 }
 0x143   : > { %4302 = vmatprep.subr.mxu1 %v4743_v36  ;;  %4292 = vmatpush3.msra.mxu0 %v1619_v37  ;;  %v1621_v42 = vld [vmem:[%s5634_s1 + $0x20] sm:$0xff]  ;;  %v1632_v45 = vld [vmem:[%s5634_s1 + $0x78] sm:$0xff]  ;;  %v1631_v47 = vld [vmem:[%s5634_s1 + $0x70] sm:$0xff] }
 0x144   : > { %4303 = vmatpush3.msra.mxu1 %v1623_v38  ;;  %4293 = vmatprep.subr.mxu0 %v4743_v36  ;;  %v1626_v48 = vld [vmem:[%s5634_s1 + $0x48] sm:$0xff]  ;;  %v1625_v50 = vld [vmem:[%s5634_s1 + $0x40] sm:$0xff]  ;;  %v1636_v52 = vld [vmem:[%s5634_s1 + $0x98] sm:$0xff] }
 0x145   : > { %4304 = vmatprep.subr.mxu1 %v4743_v36  ;;  %4294 = vmatpush3.msra.mxu0 %v1618_v39  ;;  %v1630_v49 = vld [vmem:[%s5634_s1 + $0x68] sm:$0xff]  ;;  %v1629_v51 = vld [vmem:[%s5634_s1 + $0x60] sm:$0xff]  ;;  %v1640_v53 = vld [vmem:[%s5634_s1 + $0xb8] sm:$0xff] }
 0x146   : > { %4305 = vmatpush3.msra.mxu1 %v1622_v40  ;;  %4295 = vmatprep.subr.mxu0 %v4743_v36  ;;  %v1635_v54 = vld [vmem:[%s5634_s1 + $0x90] sm:$0xff]  ;;  %v1634_v56 = vld [vmem:[%s5634_s1 + $0x88] sm:$0xff]  ;;  %v1633_v58 = vld [vmem:[%s5634_s1 + $0x80] sm:$0xff] }
 0x147   : > { %4306 = vmatprep.subr.mxu1 %v4743_v36  ;;  %4296 = vmatpush3.msra.mxu0 %v1617_v41  ;;  %v1639_v55 = vld [vmem:[%s5634_s1 + $0xb0] sm:$0xff]  ;;  %v1638_v57 = vld [vmem:[%s5634_s1 + $0xa8] sm:$0xff]  ;;  %v1637_v59 = vld [vmem:[%s5634_s1 + $0xa0] sm:$0xff] }
 0x148   : > { %4307 = vmatpush3.msra.mxu1 %v1621_v42  ;;  %4298 = vmatmul.mubr.msk.f32.vlgmr.msra.gmra.mxu0 %vm1649_vm2, %v5212_v43  ;;  %v1644_v60 = vld [vmem:[%s5634_s1 + $0xd8] sm:$0xff]  ;;  %v1643_v62 = vld [vmem:[%s5634_s1 + $0xd0] sm:$0xff]  ;;  %v1642_v0 = vld [vmem:[%s5634_s1 + $0xc8] sm:$0xff] }
 0x149   : > { %4309 = vmatmul.mubr.msk.f32.vlgmr.msra.gmra.mxu1 %vm1649_vm2, %v5212_v43  ;;  %4311 = vmatprep.subr.mxu0 %v4743_v36  ;;  %v1648_v61 = vld [vmem:[%s5634_s1 + $0xf8] sm:$0xff]  ;;  %v1647_v63 = vld [vmem:[%s5634_s1 + $0xf0] sm:$0xff]  ;;  %v1646_v1 = vld [vmem:[%s5634_s1 + $0xe8] sm:$0xff] }
 0x14a   : > { %4322 = vmatprep.subr.mxu1 %v4743_v36  ;;  %4312 = vmatpush3.msra.mxu0 %v1628_v44  ;;  %v1641_v2 = vld [vmem:[%s5634_s1 + $0xc0] sm:$0xff]  ;;  %v2227_v31 = vld [vmem:[#allocation2 + $0x70] sm:$0xff] }
 0x14b   : > { %4323 = vmatpush3.msra.mxu1 %v1632_v45  ;;  %4313 = vmatprep.subr.mxu0 %v4743_v36  ;;  %v1645_v3 = vld [vmem:[%s5634_s1 + $0xe0] sm:$0xff] }
 0x14c   : > { %4324 = vmatprep.subr.mxu1 %v4743_v36  ;;  %4314 = vmatpush3.msra.mxu0 %v1627_v46 }
 0x14d   : > { %4325 = vmatpush3.msra.mxu1 %v1631_v47  ;;  %4315 = vmatprep.subr.mxu0 %v4743_v36 }
 0x14e   : > { %4326 = vmatprep.subr.mxu1 %v4743_v36  ;;  %4316 = vmatpush3.msra.mxu0 %v1626_v48 }
 0x14f   : > { %4327 = vmatpush3.msra.mxu1 %v1630_v49  ;;  %4317 = vmatprep.subr.mxu0 %v4743_v36 }
 0x150   : > { %4328 = vmatprep.subr.mxu1 %v4743_v36  ;;  %4318 = vmatpush3.msra.mxu0 %v1625_v50 }
 0x151   : > { %4319 = vmatprep.mubr.msk.f32.mxu0 %vm4744_vm3, %v4743_v36  ;;  %4329 = vmatpush3.msra.mxu1 %v1629_v51 }
 0x152   : > { %4330 = vmatprep.mubr.msk.f32.mxu1 %vm4744_vm3, %v4743_v36  ;;  %4320 = vmatmul.mubr.msk.f32.vlgmr.msra.gmra.mxu0 %vm1649_vm2, %v5212_v43 }
 0x153   : > { %4331 = vmatmul.mubr.msk.f32.vlgmr.msra.gmra.mxu1 %vm1649_vm2, %v5212_v43  ;;  %4333 = vmatprep.subr.mxu0 %v4743_v36 }
 0x154   : > { %4344 = vmatprep.subr.mxu1 %v4743_v36  ;;  %4334 = vmatpush3.msra.mxu0 %v1636_v52 }
 0x155   : > { %4345 = vmatpush3.msra.mxu1 %v1640_v53  ;;  %4335 = vmatprep.subr.mxu0 %v4743_v36 }
 0x156   : > { %4346 = vmatprep.subr.mxu1 %v4743_v36  ;;  %4336 = vmatpush3.msra.mxu0 %v1635_v54 }
 0x157   : > { %4347 = vmatpush3.msra.mxu1 %v1639_v55  ;;  %4337 = vmatprep.subr.mxu0 %v4743_v36 }
 0x158   : > { %4348 = vmatprep.subr.mxu1 %v4743_v36  ;;  %4338 = vmatpush3.msra.mxu0 %v1634_v56 }
 0x159   : > { %4349 = vmatpush3.msra.mxu1 %v1638_v57  ;;  %4339 = vmatprep.subr.mxu0 %v4743_v36 }
 0x15a   : > { %4350 = vmatprep.subr.mxu1 %v4743_v36  ;;  %4340 = vmatpush3.msra.mxu0 %v1633_v58 }
 0x15b   : > { %4341 = vmatprep.mubr.msk.f32.mxu0 %vm4744_vm3, %v4743_v36  ;;  %4351 = vmatpush3.msra.mxu1 %v1637_v59 }
 0x15c   : > { %4352 = vmatprep.mubr.msk.f32.mxu1 %vm4744_vm3, %v4743_v36  ;;  %4342 = vmatmul.mubr.msk.f32.vlgmr.msra.gmra.mxu0 %vm1649_vm2, %v5212_v43 }
 0x15d   : > { %4353 = vmatmul.mubr.msk.f32.vlgmr.msra.gmra.mxu1 %vm1649_vm2, %v5212_v43  ;;  %4355 = vmatprep.subr.mxu0 %v4743_v36 }
 0x15e   : > { %4366 = vmatprep.subr.mxu1 %v4743_v36  ;;  %4356 = vmatpush3.msra.mxu0 %v1644_v60 }
 0x15f   : > { %4367 = vmatpush3.msra.mxu1 %v1648_v61  ;;  %4357 = vmatprep.subr.mxu0 %v4743_v36 }
 0x160   : > { %4368 = vmatprep.subr.mxu1 %v4743_v36  ;;  %4358 = vmatpush3.msra.mxu0 %v1643_v62 }
 0x161   : > { %4369 = vmatpush3.msra.mxu1 %v1647_v63  ;;  %4359 = vmatprep.subr.mxu0 %v4743_v36 }
 0x162   : > { %4370 = vmatprep.subr.mxu1 %v4743_v36  ;;  %4360 = vmatpush3.msra.mxu0 %v1642_v0 }
 0x163   : > { %4371 = vmatpush3.msra.mxu1 %v1646_v1  ;;  %4361 = vmatprep.subr.mxu0 %v4743_v36 }
 0x164   : > { %4372 = vmatprep.subr.mxu1 %v4743_v36  ;;  %4362 = vmatpush3.msra.mxu0 %v1641_v2 }
 0x165   : > { %4363 = vmatprep.mubr.msk.f32.mxu0 %vm4744_vm3, %v4743_v36  ;;  %4373 = vmatpush3.msra.mxu1 %v1645_v3 }
 0x166   : > { %4374 = vmatprep.mubr.msk.f32.mxu1 %vm4744_vm3, %v4743_v36  ;;  %4364 = vmatmul.mubr.msk.f32.vlgmr.msra.gmra.mxu0 %vm1649_vm2, %v5212_v43 }
 0x167   : > { %4375 = vmatmul.mubr.msk.f32.vlgmr.msra.gmra.mxu1 %vm1649_vm2, %v5212_v43  ;;  %4377 = vmatprep.subr.mxu0 %v4743_v36 }
 0x168   : > { %4384 = vmatprep.subr.mxu1 %v4743_v36  ;;  %4378 = vmatpush3.xpose.msk.msra.mxu0 %vm2229_vm4, %v2214_v4 }
 0x169   : > { %4385 = vmatpush3.xpose.msk.msra.mxu1 %vm2229_vm4, %v2216_v5  ;;  %4379 = vmatprep.subr.mxu0 %v4743_v36 }
 0x16a   : > { %4386 = vmatprep.subr.mxu1 %v4743_v36  ;;  %4381 = vmatprep.mubr.msk.f32.mxu0 %vm4744_vm3, %v4743_v36 }
 0x16b   : > { %4388 = vmatprep.mubr.msk.f32.mxu1 %vm4744_vm3, %v4743_v36 }
 0x16c   : > { %4380 = vmatpush3.xpose.msk.msra.mxu0 %vm2229_vm4, %v2213_v6 }
 0x16d   : > { %4387 = vmatpush3.xpose.msk.msra.mxu1 %vm2229_vm4, %v2215_v7  ;;  %4391 = vmatprep.subr.mxu0 %v4743_v36 }
 0x16e   : > { %4398 = vmatprep.subr.mxu1 %v4743_v36 }
 0x208   : > { %v1719_v10 = vpop.f32.mrf.mxu0 }
 0x209   : > { %v1789_v11 = vpop.f32.mrf.mxu1  ;;  %4382 = vmatmul.mubr.msk.f32.vlgmr.msra.gmra.mxu0 %vm2229_vm4, %v1719_v10 }
 0x20a   : > { %4389 = vmatmul.mubr.msk.f32.vlgmr.msra.gmra.mxu1 %vm2229_vm4, %v1789_v11  ;;  %v4299_v12 = vpop.f32.mrf.mxu0  ;;  %4392 = vmatpush3.xpose.msk.msra.mxu0 %vm2229_vm4, %v2218_v8 }
 0x20b   : > { %v4310_v13 = vpop.f32.mrf.mxu1  ;;  %4399 = vmatpush3.xpose.msk.msra.mxu1 %vm2229_vm4, %v2220_v9  ;;  %4393 = vmatprep.subr.mxu0 %v4743_v36 }
 0x20c   : > { %4400 = vmatprep.subr.mxu1 %v4743_v36  ;;  %4395 = vmatprep.mubr.msk.f32.mxu0 %vm4744_vm3, %v4743_v36 }
 0x20d   : > { %4402 = vmatprep.mubr.msk.f32.mxu1 %vm4744_vm3, %v4743_v36 }
 0x20e   : > { %4394 = vmatpush3.xpose.msk.msra.mxu0 %vm2229_vm4, %v2217_v14 }
 0x20f   : > { %4401 = vmatpush3.xpose.msk.msra.mxu1 %vm2229_vm4, %v2219_v15  ;;  %4405 = vmatprep.subr.mxu0 %v4743_v36 }
 0x210   : > { %4412 = vmatprep.subr.mxu1 %v4743_v36 }
 0x212   : > { %v1859_v18 = vpop.f32.mrf.mxu0 }
 0x213   : > { %v1929_v19 = vpop.f32.mrf.mxu1  ;;  %4396 = vmatmul.mubr.msk.f32.vlgmr.msra.gmra.mxu0 %vm2229_vm4, %v1859_v18 }
 0x214   : > { %4403 = vmatmul.mubr.msk.f32.vlgmr.msra.gmra.mxu1 %vm2229_vm4, %v1929_v19  ;;  %v4321_v20 = vpop.f32.mrf.mxu0  ;;  %4406 = vmatpush3.xpose.msk.msra.mxu0 %vm2229_vm4, %v2222_v16 }
 0x215   : > { %v4332_v21 = vpop.f32.mrf.mxu1  ;;  %4413 = vmatpush3.xpose.msk.msra.mxu1 %vm2229_vm4, %v2224_v17  ;;  %4407 = vmatprep.subr.mxu0 %v4743_v36 }
 0x216   : > { %4414 = vmatprep.subr.mxu1 %v4743_v36  ;;  %4409 = vmatprep.mubr.msk.f32.mxu0 %vm4744_vm3, %v4743_v36 }
 0x217   : > { %4416 = vmatprep.mubr.msk.f32.mxu1 %vm4744_vm3, %v4743_v36 }
 0x218   : > { %4408 = vmatpush3.xpose.msk.msra.mxu0 %vm2229_vm4, %v2221_v22 }
 0x219   : > { %4415 = vmatpush3.xpose.msk.msra.mxu1 %vm2229_vm4, %v2223_v23  ;;  %4419 = vmatprep.subr.mxu0 %v4743_v36 }
 0x21a   : > { %4426 = vmatprep.subr.mxu1 %v4743_v36 }
 0x21c   : > { %v1999_v26 = vpop.f32.mrf.mxu0 }
 0x21d   : > { %v2069_v27 = vpop.f32.mrf.mxu1  ;;  %4410 = vmatmul.mubr.msk.f32.vlgmr.msra.gmra.mxu0 %vm2229_vm4, %v1999_v26 }
 0x21e   : > { %4417 = vmatmul.mubr.msk.f32.vlgmr.msra.gmra.mxu1 %vm2229_vm4, %v2069_v27  ;;  %v4343_v28 = vpop.f32.mrf.mxu0  ;;  %4420 = vmatpush3.xpose.msk.msra.mxu0 %vm2229_vm4, %v2226_v24 }
 0x21f   : > { %v4354_v29 = vpop.f32.mrf.mxu1  ;;  %4427 = vmatpush3.xpose.msk.msra.mxu1 %vm2229_vm4, %v2228_v25  ;;  %4421 = vmatprep.subr.mxu0 %v4743_v36 }
 0x220   : > { %4428 = vmatprep.subr.mxu1 %v4743_v36  ;;  %4423 = vmatprep.mubr.msk.f32.mxu0 %vm4744_vm3, %v4743_v36 }
 0x221   : > { %4430 = vmatprep.mubr.msk.f32.mxu1 %vm4744_vm3, %v4743_v36 }
 0x222   : > { %4422 = vmatpush3.xpose.msk.msra.mxu0 %vm2229_vm4, %v2225_v30 }
 0x223   : > { %4429 = vmatpush3.xpose.msk.msra.mxu1 %vm2229_vm4, %v2227_v31  ;;  %4447 = vmatprep.subr.mxu0 %v4743_v36 }
 0x224   : > { %4433 = vmatprep.subr.mxu1 %v4743_v36 }
 0x226   : > { %v2139_v32 = vpop.f32.mrf.mxu0 }
 0x227   : > { %v2209_v33 = vpop.f32.mrf.mxu1  ;;  %4424 = vmatmul.mubr.msk.f32.vlgmr.msra.gmra.mxu0 %vm2229_vm4, %v2139_v32 }
 0x228   : > { %4431 = vmatmul.mubr.msk.f32.vlgmr.msra.gmra.mxu1 %vm2229_vm4, %v2209_v33  ;;  %v4365_v34 = vpop.f32.mrf.mxu0  ;;  %4451 = vmatprep.mubr.msk.f32.mxu0 %vm4744_vm3, %v4743_v36  ;;  %v2960_v33 = vld [vmem:[#allocation3 + $0x8] sm:$0xff] }
 0x229   : > { %v4376_v35 = vpop.f32.mrf.mxu1  ;;  %4437 = vmatprep.mubr.msk.f32.mxu1 %vm4744_vm3, %v4743_v36  ;;  %v2959_v34 = vld [vmem:[#allocation3] sm:$0xff]  ;;  %4434 = vmatpush3.msra.mxu1 %v2960_v33 }
 0x22a   : > { %4435 = vmatprep.subr.mxu1 %v4743_v36 }
 0x22b   : > { %4436 = vmatpush3.msra.mxu1 %v2959_v34 }
 0x22c   : > { %4440 = vmatprep.subr.mxu1 %v4743_v36 }
 0x2c9   : > { %v2305_v37 = vpop.f32.mrf.mxu0 }
 0x2ca   : > { %v2384_v38 = vpop.f32.mrf.mxu1  ;;  %v2863_v39 = vsel %vm2862_vm5, %v2305_v37, -inf }
 0x2cb   : > { %2864 = vmax.xlane.f32.xlu0 %v2863_v39  ;;  %v4383_v41 = vpop.f32.mrf.mxu0  ;;  %v2866_v42 = vsel %vm2862_vm5, %v2384_v38, -inf }
 0x2cc   : > { %v4390_v40 = vpop.f32.mrf.mxu1  ;;  %v2963_v41 = vld [vmem:[#allocation3 + $0x20] sm:$0xff] }
 0x2cd   : > { %v2964_v40 = vld [vmem:[#allocation3 + $0x28] sm:$0xff] }
 0x2ce   : > { %4448 = vmatpush3.msra.mxu0 %v2964_v40 }
 0x2cf   : > { %2867 = vmax.xlane.f32.xlu0 %v2866_v42  ;;  %4449 = vmatprep.subr.mxu0 %v4743_v36 }
 0x2d0   : > { %4450 = vmatpush3.msra.mxu0 %v2963_v41 }
 0x2d1   : > { %4461 = vmatprep.subr.mxu0 %v4743_v36 }
 0x2d3   : > { %v2463_v43 = vpop.f32.mrf.mxu0 }
 0x2d4   : > { %v2542_v44 = vpop.f32.mrf.mxu1  ;;  %v2869_v45 = vsel %vm2862_vm5, %v2463_v43, -inf }
 0x2d5   : > { %2870 = vmax.xlane.f32.xlu1 %v2869_v45  ;;  %v4397_v47 = vpop.f32.mrf.mxu0  ;;  %v2872_v48 = vsel %vm2862_vm5, %v2542_v44, -inf }
 0x2d6   : > { %v4404_v46 = vpop.f32.mrf.mxu1 }
 0x2d9   : > { %2873 = vmax.xlane.f32.xlu1 %v2872_v48  ;;  %v2962_v48 = vld [vmem:[#allocation3 + $0x18] sm:$0xff] }
 0x2dd   : > { %v2621_v49 = vpop.f32.mrf.mxu0 }
 0x2de   : > { %v2700_v50 = vpop.f32.mrf.mxu1  ;;  %v2875_v52 = vsel %vm2862_vm5, %v2621_v49, -inf }
 0x2df   : > { %v2878_v51 = vsel %vm2862_vm5, %v2700_v50, -inf  ;;  %2876 = vmax.xlane.f32.xlu0 %v2875_v52  ;;  %v4411_v54 = vpop.f32.mrf.mxu0  ;;  %v2966_v52 = vld [vmem:[#allocation3 + $0x38] sm:$0xff] }
 0x2e0   : > { %v4418_v53 = vpop.f32.mrf.mxu1  ;;  %2879 = vmax.xlane.f32.xlu1 %v2878_v51 }
 0x2e7   : > { %v2779_v55 = vpop.f32.mrf.mxu0 }
 0x2e8   : > { %v2858_v56 = vpop.f32.mrf.mxu1  ;;  %v2881_v58 = vsel %vm2862_vm5, %v2779_v55, -inf }
 0x2e9   : > { %v2884_v57 = vsel %vm2862_vm5, %v2858_v56, -inf  ;;  %2882 = vmax.xlane.f32.xlu0 %v2881_v58  ;;  %v4425_v60 = vpop.f32.mrf.mxu0  ;;  %v2968_v58 = vld [vmem:[#allocation3 + $0x48] sm:$0xff] }
 0x2ea   : > { %v4432_v59 = vpop.f32.mrf.mxu1  ;;  %2885 = vmax.xlane.f32.xlu1 %v2884_v57 }
 0x2eb   : > { %v2967_v59 = vld [vmem:[#allocation3 + $0x40] sm:$0xff] }
 0x354   : > { %v2865_v61 = vpop.xlane.xlu0 %2864 }
 0x355   : > { %v2887_v62 = vsub.f32 %v2305_v37, %v2865_v61 }
 0x357   : > { %v2895_v63 = vmul.f32 1.442695, %v2887_v62  ;;  %v2970_v62 = vld [vmem:[#allocation3 + $0x58] sm:$0xff] }
 0x358   : > { %v2868_v0 = vpop.xlane.xlu0 %2867 }
 0x359   : > { %4587 = vpow2.f32 %v2895_v63  ;;  %v2888_v1 = vsub.f32 %v2384_v38, %v2868_v0 }
 0x35b   : > { %v2897_v2 = vmul.f32 1.442695, %v2888_v1  ;;  %v2969_v1 = vld [vmem:[#allocation3 + $0x50] sm:$0xff] }
 0x35d   : > { %4589 = vpow2.f32 %v2897_v2 }
 0x35e   : > { %v2871_v3 = vpop.xlane.xlu1 %2870 }
 0x35f   : > { %v2889_v4 = vsub.f32 %v2463_v43, %v2871_v3 }
 0x361   : > { %v2899_v5 = vmul.f32 1.442695, %v2889_v4 }
 0x362   : > { %v2874_v6 = vpop.xlane.xlu1 %2873 }
 0x363   : > { %4591 = vpow2.f32 %v2899_v5  ;;  %v2890_v7 = vsub.f32 %v2542_v44, %v2874_v6  ;;  %v2974_v5 = vld [vmem:[#allocation3 + $0x78] sm:$0xff] }
 0x365   : > { %v2901_v8 = vmul.f32 1.442695, %v2890_v7  ;;  %v2972_v7 = vld [vmem:[#allocation3 + $0x68] sm:$0xff] }
 0x366   : > { %v4588_v9 = vpop.eup %4587 }
 0x367   : > { %4593 = vpow2.f32 %v2901_v8  ;;  %v2911_v10 = vsel %vm2862_vm5, %v4588_v9, 0.0  ;;  %v2971_v8 = vld [vmem:[#allocation3 + $0x60] sm:$0xff] }
 0x368   : > { %v2877_v12 = vpop.xlane.xlu0 %2876  ;;  %2912 = vadd.xlane.f32.xlu0 %v2911_v10 }
 0x369   : > { %v2880_v11 = vpop.xlane.xlu1 %2879  ;;  %v2891_v14 = vsub.f32 %v2621_v49, %v2877_v12  ;;  %v2961_v49 = vld [vmem:[#allocation3 + $0x10] sm:$0xff] }
 0x36a   : > { %v2892_v13 = vsub.f32 %v2700_v50, %v2880_v11  ;;  %v5413_v15 = vpop.eup %4589 }
 0x36b   : > { %v2903_v17 = vmul.f32 1.442695, %v2891_v14  ;;  %v2914_v18 = vsel %vm2862_vm5, %v5413_v15, 0.0 }
 0x36c   : > { %v2905_v16 = vmul.f32 1.442695, %v2892_v13  ;;  %2915 = vadd.xlane.f32.xlu1 %v2914_v18  ;;  %v3602_v18 = vld [vmem:[%s5616_s4 + $0x18] sm:$0xff] }
 0x36e   : > { %4595 = vpow2.f32 %v2905_v16 }
 0x36f   : > { %4597 = vpow2.f32 %v2903_v17 }
 0x370   : > { %v5417_v19 = vpop.eup %4591 }
 0x371   : > { %v2917_v20 = vsel %vm2862_vm5, %v5417_v19, 0.0 }
 0x372   : > { %v2883_v22 = vpop.xlane.xlu0 %2882  ;;  %2918 = vadd.xlane.f32.xlu0 %v2917_v20 }
 0x373   : > { %v2886_v21 = vpop.xlane.xlu1 %2885  ;;  %v2893_v24 = vsub.f32 %v2779_v55, %v2883_v22  ;;  %v2965_v55 = vld [vmem:[#allocation3 + $0x30] sm:$0xff] }
 0x374   : > { %v2894_v23 = vsub.f32 %v2858_v56, %v2886_v21  ;;  %v5421_v25 = vpop.eup %4593  ;;  %v3600_v21 = vld [vmem:[%s5616_s4 + $0x8] sm:$0xff] }
 0x375   : > { %v2907_v27 = vmul.f32 1.442695, %v2893_v24  ;;  %v2920_v28 = vsel %vm2862_vm5, %v5421_v25, 0.0 }
 0x376   : > { %v2909_v26 = vmul.f32 1.442695, %v2894_v23  ;;  %2921 = vadd.xlane.f32.xlu1 %v2920_v28 }
 0x378   : > { %4599 = vpow2.f32 %v2909_v26 }
 0x379   : > { %4601 = vpow2.f32 %v2907_v27 }
 0x37b   : > { %v5425_v29 = vpop.eup %4595 }
 0x37c   : > { %v5427_v30 = vpop.eup %4597  ;;  %v2926_v31 = vsel %vm2862_vm5, %v5425_v29, 0.0 }
 0x37d   : > { %2927 = vadd.xlane.f32.xlu1 %v2926_v31  ;;  %v2923_v32 = vsel %vm2862_vm5, %v5427_v30, 0.0 }
 0x37e   : > { %2924 = vadd.xlane.f32.xlu0 %v2923_v32 }
 0x385   : > { %v5434_v35 = vpop.eup %4599 }
 0x386   : > { %v5437_v37 = vpop.eup %4601  ;;  %v2932_v38 = vsel %vm2862_vm5, %v5434_v35, 0.0 }
 0x387   : > { %2933 = vadd.xlane.f32.xlu1 %v2932_v38  ;;  %v2929_v39 = vsel %vm2862_vm5, %v5437_v37, 0.0 }
 0x388   : > { %2930 = vadd.xlane.f32.xlu0 %v2929_v39 }
 0x3f1   : > { %v2913_v42 = vpop.xlane.xlu0 %2912 }
 0x3f2   : > { %4603 = vrcp.f32 %v2913_v42 }
 0x3f5   : > { %v2916_v43 = vpop.xlane.xlu1 %2915 }
 0x3f6   : > { %4605 = vrcp.f32 %v2916_v43 }
 0x3fb   : > { %v2919_v44 = vpop.xlane.xlu0 %2918 }
 0x3fc   : > { %4607 = vrcp.f32 %v2919_v44 }
 0x3ff   : > { %v4604_v45 = vpop.eup %4603  ;;  %v2922_v46 = vpop.xlane.xlu1 %2921 }
 0x400   : > { %4609 = vrcp.f32 %v2922_v46  ;;  %v2943_v47 = vmul.f32 %v4604_v45, %v4588_v9  ;;  %v2973_v9 = vld [vmem:[#allocation3 + $0x70] sm:$0xff] }
 0x402   : > { %2951 = vst.msk [vmem:[%s4881_s17] sm:$0xff] %vm2862_vm5, %v2943_v47  ;;  %4438 = vmatmul.mubr.msk.f32.vlgmr.msra.gmra.mxu1 %vm2862_vm5, %v2943_v47 }
 0x403   : > { %v4606_v50 = vpop.eup %4605  ;;  %4441 = vmatpush3.msra.mxu1 %v2962_v48  ;;  %4444 = vmatprep.mubr.msk.f32.mxu1 %vm4744_vm3, %v4743_v36 }
 0x404   : > { %4442 = vmatprep.subr.mxu1 %v4743_v36  ;;  %v2944_v51 = vmul.f32 %v4606_v50, %v5413_v15 }
 0x405   : > { %4443 = vmatpush3.msra.mxu1 %v2961_v49 }
 0x406   : > { %v2928_v53 = vpop.xlane.xlu1 %2927  ;;  %2952 = vst.msk [vmem:[%s4881_s17 + $0x8] sm:$0xff] %vm2862_vm5, %v2944_v51  ;;  %4445 = vmatmul.mubr.msk.f32.vlgmr.msra.gmra.mxu1 %vm2862_vm5, %v2944_v51  ;;  %4454 = vmatprep.subr.mxu1 %v4743_v36 }
 0x407   : > { %4611 = vrcp.f32 %v2928_v53  ;;  %v2925_v54 = vpop.xlane.xlu0 %2924  ;;  %4455 = vmatpush3.msra.mxu1 %v2966_v52  ;;  %4458 = vmatprep.mubr.msk.f32.mxu1 %vm4744_vm3, %v4743_v36 }
 0x408   : > { %4613 = vrcp.f32 %v2925_v54  ;;  %4456 = vmatprep.subr.mxu1 %v4743_v36 }
 0x409   : > { %v4608_v56 = vpop.eup %4607  ;;  %4457 = vmatpush3.msra.mxu1 %v2965_v55 }
 0x40a   : > { %v2945_v57 = vmul.f32 %v4608_v56, %v5417_v19  ;;  %4468 = vmatprep.subr.mxu1 %v4743_v36  ;;  %v3601_v19 = vld [vmem:[%s5616_s4 + $0x10] sm:$0xff] }
 0x40c   : > { %2953 = vst.msk [vmem:[%s4881_s17 + $0x10] sm:$0xff] %vm2862_vm5, %v2945_v57  ;;  %4452 = vmatmul.mubr.msk.f32.vlgmr.msra.gmra.mxu0 %vm2862_vm5, %v2945_v57 }
 0x40d   : > { %v4610_v60 = vpop.eup %4609  ;;  %4462 = vmatpush3.msra.mxu0 %v2968_v58  ;;  %4465 = vmatprep.mubr.msk.f32.mxu0 %vm4744_vm3, %v4743_v36 }
 0x40e   : > { %v2946_v61 = vmul.f32 %v4610_v60, %v5421_v25  ;;  %4463 = vmatprep.subr.mxu0 %v4743_v36  ;;  %v3599_v25 = vld [vmem:[%s5616_s4] sm:$0xff] }
 0x40f   : > { %4464 = vmatpush3.msra.mxu0 %v2967_v59 }
 0x410   : > { %v2934_v63 = vpop.xlane.xlu1 %2933  ;;  %2954 = vst.msk [vmem:[%s4881_s17 + $0x18] sm:$0xff] %vm2862_vm5, %v2946_v61  ;;  %4459 = vmatmul.mubr.msk.f32.vlgmr.msra.gmra.mxu1 %vm2862_vm5, %v2946_v61  ;;  %4475 = vmatprep.subr.mxu0 %v4743_v36 }
 0x411   : > { %4615 = vrcp.f32 %v2934_v63  ;;  %v2931_v0 = vpop.xlane.xlu0 %2930  ;;  %4469 = vmatpush3.msra.mxu1 %v2970_v62  ;;  %4472 = vmatprep.mubr.msk.f32.mxu1 %vm4744_vm3, %v4743_v36 }
 0x412   : > { %4617 = vrcp.f32 %v2931_v0  ;;  %4470 = vmatprep.subr.mxu1 %v4743_v36 }
 0x413   : > { %4471 = vmatpush3.msra.mxu1 %v2969_v1 }
 0x414   : > { %v4612_v2 = vpop.eup %4611  ;;  %4482 = vmatprep.subr.mxu1 %v4743_v36 }
 0x415   : > { %v4614_v3 = vpop.eup %4613  ;;  %v2948_v4 = vmul.f32 %v4612_v2, %v5425_v29 }
 0x416   : > { %v2947_v6 = vmul.f32 %v4614_v3, %v5427_v30 }
 0x417   : > { %2956 = vst.msk [vmem:[%s4881_s17 + $0x28] sm:$0xff] %vm2862_vm5, %v2948_v4  ;;  %4473 = vmatmul.mubr.msk.f32.vlgmr.msra.gmra.mxu1 %vm2862_vm5, %v2948_v4 }
 0x418   : > { %2955 = vst.msk [vmem:[%s4881_s17 + $0x20] sm:$0xff] %vm2862_vm5, %v2947_v6  ;;  %4466 = vmatmul.mubr.msk.f32.vlgmr.msra.gmra.mxu0 %vm2862_vm5, %v2947_v6  ;;  %4483 = vmatpush3.msra.mxu1 %v2974_v5 }
 0x419   : > { %4476 = vmatpush3.msra.mxu0 %v2972_v7  ;;  %4484 = vmatprep.subr.mxu1 %v4743_v36 }
 0x41a   : > { %4477 = vmatprep.subr.mxu0 %v4743_v36  ;;  %4479 = vmatprep.mubr.msk.f32.mxu0 %vm4744_vm3, %v4743_v36 }
 0x41b   : > { %4478 = vmatpush3.msra.mxu0 %v2971_v8  ;;  %4485 = vmatpush3.msra.mxu1 %v2973_v9 }
 0x41c   : > { %4486 = vmatprep.mubr.msk.f32.mxu1 %vm4744_vm3, %v4743_v36  ;;  %4489 = vmatprep.subr.mxu0 %v4743_v36 }
 0x41e   : > { %v4616_v10 = vpop.eup %4615 }
 0x41f   : > { %v4618_v11 = vpop.eup %4617  ;;  %v2950_v12 = vmul.f32 %v4616_v10, %v5434_v35 }
 0x420   : > { %v2949_v13 = vmul.f32 %v4618_v11, %v5437_v37 }
 0x421   : > { %2958 = vst.msk [vmem:[%s4881_s17 + $0x38] sm:$0xff] %vm2862_vm5, %v2950_v12  ;;  %4487 = vmatmul.mubr.msk.f32.vlgmr.msra.gmra.mxu1 %vm2862_vm5, %v2950_v12 }
 0x422   : > { %2957 = vst.msk [vmem:[%s4881_s17 + $0x30] sm:$0xff] %vm2862_vm5, %v2949_v13  ;;  %4480 = vmatmul.mubr.msk.f32.vlgmr.msra.gmra.mxu0 %vm2862_vm5, %v2949_v13 }
 0x423   : > { %4497 = vmatprep.mubr.msk.f32.mxu0 %vm4744_vm3, %v4743_v36  ;;  %4490 = vmatpush3.msra.mxu0 %v3602_v18 }
 0x424   : > { %4491 = vmatprep.subr.mxu0 %v4743_v36 }
 0x425   : > { %4492 = vmatpush3.msra.mxu0 %v3601_v19 }
 0x426   : > { %4493 = vmatprep.subr.mxu0 %v4743_v36 }
 0x427   : > { %4494 = vmatpush3.msra.mxu0 %v3600_v21 }
 0x428   : > { %4495 = vmatprep.subr.mxu0 %v4743_v36 }
 0x429   : > { %4496 = vmatpush3.msra.mxu0 %v3599_v25 }
 0x4c2   : > { %v3044_v14 = vpop.f32.mrf.mxu1 }
 0x4c4   : > { %v4439_v15 = vpop.f32.mrf.mxu1 }
 0x4c6   : > { %v3117_v16 = vpop.f32.mrf.mxu1 }
 0x4c7   : > { %3560 = vrot.lane.b32.xlu0 %v3117_v16, %s4745_s13  ;;  %s4749_s13 = smov 16  }
 0x4c8   : > { %v4446_v17 = vpop.f32.mrf.mxu1 }
 0x4cc   : > { %v3190_v20 = vpop.f32.mrf.mxu0 }
 0x4cd   : > { %3564 = vrot.lane.b32.xlu1 %v3190_v20, %s4746_s21 }
 0x4ce   : > { %v4453_v22 = vpop.f32.mrf.mxu0 }
 0x4d0   : > { %v3263_v23 = vpop.f32.mrf.mxu1 }
 0x4d1   : > { %3568 = vrot.lane.b32.xlu1 %v3263_v23, %s4747_s9 }
 0x4d2   : > { %v4460_v24 = vpop.f32.mrf.mxu1 }
 0x4d7   : > { %v3409_v26 = vpop.f32.mrf.mxu1 }
 0x4d8   : > { %v3336_v27 = vpop.f32.mrf.mxu0  ;;  %3576 = vrot.lane.b32.xlu0 %v3409_v26, %s4748_s19  ;;  %s3690_s19 = scalar_lea.sflag [#allocation7], %s4868_s20 }
 0x4d9   : > { %3572 = vrot.lane.b32.xlu1 %v3336_v27, %s4749_s13  ;;  %v4474_v28 = vpop.f32.mrf.mxu1  ;;  %s4619_s13 = scalar_lea.vmem %s5528_s11, 1024 }
 0x4da   : > { %v4467_v29 = vpop.f32.mrf.mxu0  ;;  %p4620_p0 = scmp.ne.s32.totalorder %s5528_s11, %s4619_s13 }
 0x4dc   : > { %p4621_p1 = pnand %p4620_p0, %p4847_p3 }
 0x4de   : > { %p4622_p2 = pneg %p4621_p1 }
 0x4e1   : > { %v3555_v30 = vpop.f32.mrf.mxu1 }
 0x4e2   : > { %v3482_v31 = vpop.f32.mrf.mxu0  ;;  %3584 = vrot.lane.b32.xlu0 %v3555_v30, %s4750_s10  ;;  %s4752_s10 = smov [#allocation6]  }
 0x4e3   : > { %3580 = vrot.lane.b32.xlu1 %v3482_v31, %s4751_s18  ;;  %v4488_v36 = vpop.f32.mrf.mxu1  ;;  %s4623_s18 = sshll.u32 %s4752_s10, 4  ;;  %s4624_s18 = int_to_ptr.vmem [resolvable:$false] %s4623_s18 }
 0x4e4   : > { %v4481_v32 = vpop.f32.mrf.mxu0  ;;  %s4625_s17 = scalar_lea.vmem %s4624_s18, 2048  ;;  %p4626_p4 = scmp.lt.s32.totalorder %s5528_s11, %s4624_s18 }
 0x4e5   : > { %p4627_p5 = scmp.lt.s32.totalorder %s4625_s17, %s4619_s13 }
 0x4e7   : > { %p4628_p6 = por %p4627_p5, %p4626_p4 }
 0x4e9   : > { %p4629_p7 = pnand %p4628_p6, %p4622_p2 }
 0x539   : > { %v3561_v35 = vpop.permute.xlu0 %3560 }
 0x53a   : > { %v3587_v37 = vsel %vm2229_vm4, %v3044_v14, %v3561_v35 }
 0x53f   : > { %v3565_v33 = vpop.permute.xlu1 %3564 }
 0x540   : > { %v3589_v39 = vsel %vm3588_vm6, %v3587_v37, %v3565_v33 }
 0x543   : > { %v3569_v34 = vpop.permute.xlu1 %3568 }
 0x544   : > { %v3591_v41 = vsel %vm3590_vm7, %v3589_v39, %v3569_v34 }
 0x54a   : > { %v3577_v40 = vpop.permute.xlu0 %3576 }
 0x54b   : > { %v3573_v38 = vpop.permute.xlu1 %3572 }
 0x54c   : > { %v3592_v42 = vsel %vm2862_vm5, %v3591_v41, %v3573_v38 }
 0x54d   : > { %v3594_v44 = vsel %vm3593_vm8, %v3592_v42, %v3577_v40 }
 0x554   : > { %v3585_v43 = vpop.permute.xlu0 %3584 }
 0x555   : > { %v3581_v45 = vpop.permute.xlu1 %3580 }
 0x556   : > { %v3596_v46 = vsel %vm3595_vm9, %v3594_v44, %v3581_v45 }
 0x557   : > { %v3598_v47 = vsel %vm3597_vm10, %v3596_v46, %v3585_v43 }
 0x558   : > { %4498 = vmatmul.mubr.msk.f32.vlgmr.msra.gmra.mxu0 %vm1649_vm2, %v3598_v47 }
 0x559   : > { %4632 = shalt.err (!%p4629_p7)
}
 0x55a   : > { %s4633_s23 = scalar_lea.hbm %s5526_s30, 1024  ;;  %s4637_s9 = scalar_lea.hbm %s5619_s7, 4096 }
 0x55b   : > { %p4634_p9 = scmp.ne.s32.totalorder %s5526_s30, %s4633_s23  ;;  %p4638_p12 = scmp.lt.s32.totalorder %s5526_s30, %s5619_s7 }
 0x55c   : > { %p4639_p13 = scmp.lt.s32.totalorder %s4637_s9, %s4633_s23 }
 0x55d   : > { %p4635_p10 = pnand %p4634_p9, %p4847_p3 }
 0x55e   : > { %p4640_p0 = por %p4639_p13, %p4638_p12 }
 0x55f   : > { %p4636_p11 = pneg %p4635_p10 }
 0x561   : > { %p4641_p1 = pnand %p4640_p0, %p4636_p11 }
 0x563   : > { %4644 = shalt.err (!%p4641_p1)
}
 0x564   : > { %s4753_s13 = smov 128   ;;  %s4754_s18 = smov 256   ;;  %v3913_v48 = vld [vmem:[%s5617_s5] ss:$0 sm:$0xff] }
 0x565   : > { %4501 = dma.vmem_to_hbm [thread:$0]  (%p4847_p3), %s5528_s11, 1024, %s5526_s30, %s3690_s19, %s4753_s13, %s4754_s18, %s4746_s21  }
 0x566   : > { %s3917_s17 = sshll.u32 %s4729_s28, 1  ;;  %s3705_s29 = sshll.u32 %s4879_s16, 4  ;;  %s3706_s29 = int_to_ptr.vmem [resolvable:$true] %s3705_s29 }
 0x567   : > { %s3701_s23 = sadd.s32 %s4725_s27, %s3917_s17  ;;  %s3685_s21 = scalar_lea.sflag [#allocation5], %s4868_s20 }
 0x568   : > { %s3918_s9 = sshll.u32 %s3701_s23, 7  ;;  %s4645_s28 = scalar_lea.vmem %s3706_s29, 128 }
 0x569   : > { %s5563_s1 = scalar_lea.hbm %s5618_s6, %s3918_s9  ;;  %p4646_p2 = scmp.ne.s32.totalorder %s3706_s29, %s4645_s28 }
 0x56a   : > { %s4755_s27 = smov [#allocation4]  }
 0x56b   : > { %p4647_p4 = pnand %p4646_p2, %p4847_p3  ;;  %s4649_s11 = sshll.u32 %s4755_s27, 4  ;;  %s4650_s11 = int_to_ptr.vmem [resolvable:$false] %s4649_s11 }
 0x56c   : > { %s4651_s30 = scalar_lea.vmem %s4650_s11, 256  ;;  %p4652_p6 = scmp.lt.s32.totalorder %s3706_s29, %s4650_s11 }
 0x56d   : > { %p4648_p5 = pneg %p4647_p4  ;;  %p4653_p7 = scmp.lt.s32.totalorder %s4651_s30, %s4645_s28 }
 0x56f   : > { %p4654_p9 = por %p4653_p7, %p4652_p6 }
 0x571   : > { %p4655_p10 = pnand %p4654_p9, %p4648_p5 }
 0x618   : > { %v3679_v49 = vpop.f32.mrf.mxu0 }
 0x619   : > { %v3680_v50 = vadd.f32 %v3913_v48, %v3679_v49 }
 0x61a   : > { %v4499_v51 = vpop.f32.mrf.mxu0 }
 0x61b   : > { %3683 = vst.msk [vmem:[%s4879_s16] sm:$0xff] %vm1649_vm2, %v3680_v50 }
 0x61c   : > { %4658 = shalt.err (!%p4655_p10)
}
 0x61d   : > { %s4659_s0 = scalar_lea.hbm %s5563_s1, 128  ;;  %s4663_s19 = scalar_lea.hbm %s5618_s6, 512 }
 0x61e   : > { %p4660_p11 = scmp.ne.s32.totalorder %s5563_s1, %s4659_s0  ;;  %p4664_p0 = scmp.lt.s32.totalorder %s5563_s1, %s5618_s6 }
 0x61f   : > { %p4665_p1 = scmp.lt.s32.totalorder %s4663_s19, %s4659_s0 }
 0x620   : > { %p4661_p12 = pnand %p4660_p11, %p4847_p3 }
 0x621   : > { %p4666_p2 = por %p4665_p1, %p4664_p0 }
 0x622   : > { %p4662_p13 = pneg %p4661_p12 }
 0x624   : > { %p4667_p4 = pnand %p4666_p2, %p4662_p13 }
 0x626   : > { %4670 = shalt.err (!%p4667_p4)
}
 0x627   : > { %4500 = dma.vmem_to_hbm [thread:$0]  (%p4847_p3), %s3706_s29, 128, %s5563_s1, %s3685_s21  }
 0x628 PF: > { %p4511_p5 = scmp.ge.s32.totalorder %s4741_s8, 2  ;;  %s3734_s17 = sand.u32 1, %s4713_s24  }
 0x629   : > { %s3735_s23 = scalar_lea.sflag [#allocation5], %s3734_s17 }
 0x62a   : > { %p4505_p6 = pnand %p4511_p5, %p4856_p8 }
 0x62c   : > { %p4506_p7 = pneg %p4505_p6 }
 0x62e   : > { %4704 = dma.done.wait (%p4506_p7), %s3735_s23, 128  }
 0x62f   : > { %4706 = vsyncadd (%p4506_p7), %s3735_s23, 4294967168  ;;  %s3744_s12 = scalar_lea.sflag [#allocation7], %s3734_s17 }
 0x630   : > { %4708 = dma.done.wait (%p4506_p7), %s3744_s12, 1024  }
 0x631   : > { %4710 = vsyncadd (%p4506_p7), %s3744_s12, 4294966272  ;;  %s24_s8 = sadd.s32 1, %s4741_s8   ;;  %s5635_s1 = sld [smem:[#allocation14_spill]] }
 0x632   : > { %p21_p9 = scmp.ge.s32.totalorder %s24_s8, 6   ;;  %s5636_s27 = sld [smem:[#allocation10_spill]] }
 0x633   : > { %s5637_s28 = sld [smem:[#allocation11_spill]]  ;;  %s5640_s24 = smov %s4717_s25 }
 0x634   : > { %s5638_s29 = sld [smem:[#allocation12_spill]]  ;;  %s5641_s25 = smov %s4721_s26 }
 0x635   : > { %s5639_s30 = sld [smem:[#allocation13_spill]]  ;;  %23 = sbr.rel (!%p21_p9) target bundleno = 10 (0xa), region = 101 }
 0x637   : > { %s5642_s26 = smov %s5635_s1 }
 0x63a   :  { %3749 = vsyncpa [#allocation5], 1 }
 0x63b   :  { %3751 = vsyncpa [#allocation5 + $0x1], 1 }
 0x63c   :  { %3752 = vsyncpa [#allocation7], 1 }
 0x63d   :  { %3754 = vsyncpa [#allocation7 + $0x1], 1 }

</bundles_post_ra>
